<compile_context>
chip_gen: v7x
topology: tpu7x:2x2x1
jax: 0.10.0
libtpu: 0.0.40
codegen_flags: <defaults>
</compile_context>

<pallas_src>
import functools

import jax
import jax.numpy as jnp
from jax.experimental import pallas as pl
from jax.experimental.pallas import tpu as pltpu


# ----------------------------------------------------------------------------
# Kernel: conv1/2/3 (+folded BN, ReLU) -> max-pool -> fc1/2/3, all in one pass.
# ----------------------------------------------------------------------------
def _stn3d_kernel(x_ref,                 # (bt*N, 3)        f32
                  w1_ref, b1_ref,        # (3, 64)   f32,   (1, 64)   f32
                  w2_ref, b2_ref,        # (64, 128) bf16,  (1, 128)  f32
                  w3_ref, b3_ref,        # (128,1024)bf16,  (1, 1024) f32
                  fw1_ref, fb1_ref,      # (1024,512)bf16,  (1, 512)  f32
                  fw2_ref, fb2_ref,      # (512, 256)bf16,  (1, 256)  f32
                  fw3_ref, fb3_ref,      # (256, 128)bf16,  (1, 128)  f32 (padded)
                  out_ref,               # (bt, 1, 128)     f32
                  pooled_ref,            # (bt, 1024)       f32 VMEM scratch
                  *, bt, n, c3_chunk):
    # conv1 + bn1 + relu on the VPU: Cin=3 -> three broadcast FMAs in f32
    # (a K=3 MXU matmul would waste the contraction depth).
    x = x_ref[...]                                            # (rows, 3) f32
    w1 = w1_ref[...]
    h = (x[:, 0:1] * w1[0:1, :]
         + x[:, 1:2] * w1[1:2, :]
         + x[:, 2:3] * w1[2:3, :]
         + b1_ref[...])
    h = jnp.maximum(h, 0.0).astype(jnp.bfloat16)              # (rows, 64)

    # conv2 + bn2 + relu (MXU, bf16 operands, f32 accumulation).
    h = jnp.dot(h, w2_ref[...], preferred_element_type=jnp.float32) + b2_ref[...]
    h = jnp.maximum(h, 0.0).astype(jnp.bfloat16)              # (rows, 128)

    # conv3, chunked over output channels.  Bias + ReLU are deferred past the
    # max-pool (max_i relu(z_i + b) == relu(max_i z_i + b)), so only the raw
    # matmul chunk is materialized and each chunk is pooled on the spot.
    for c0 in range(0, 1024, c3_chunk):                       # static, 4 iters
        z = jnp.dot(h, w3_ref[:, c0:c0 + c3_chunk],
                    preferred_element_type=jnp.float32)       # (rows, chunk)
        pooled_ref[:, c0:c0 + c3_chunk] = jnp.max(
            z.reshape(bt, n, c3_chunk), axis=1)               # (bt, chunk)

    # Deferred bn3 bias + relu on the tiny pooled block.
    g = jnp.maximum(pooled_ref[...] + b3_ref[...], 0.0).astype(jnp.bfloat16)

    # FC stack (fc1+bn4+relu, fc2+bn5+relu, fc3 + folded (1,3,3) bias), fused.
    f = jnp.dot(g, fw1_ref[...], preferred_element_type=jnp.float32) + fb1_ref[...]
    f = jnp.maximum(f, 0.0).astype(jnp.bfloat16)              # (bt, 512)
    f = jnp.dot(f, fw2_ref[...], preferred_element_type=jnp.float32) + fb2_ref[...]
    f = jnp.maximum(f, 0.0).astype(jnp.bfloat16)              # (bt, 256)
    o = jnp.dot(f, fw3_ref[...], preferred_element_type=jnp.float32) + fb3_ref[...]
    out_ref[...] = o[:, None, :]                              # (bt, 1, 128) f32


# ----------------------------------------------------------------------------
# Wrapper
# ----------------------------------------------------------------------------
def _const_spec(shape):
    """Full-array block, same block every grid step (weights stay resident)."""
    ndim = len(shape)
    return pl.BlockSpec(shape, lambda *_: (0,) * ndim)


def _choose_bt(B, N, target_rows=2048):
    """Batch-tile size: fill the MXU M dim (~target_rows) but keep >=2 grid
    steps when possible (v7x megacore) and bound the per-step VMEM footprint."""
    bt = max(1, min(B, target_rows // max(N, 1)))
    if B >= 2:
        bt = max(1, min(bt, B // 2))
    while B % bt:
        bt -= 1
    return bt


def stn3d_forward(x_bcn, params, *, bt=None, c3_chunk=256):
    """x_bcn: (B, 3, N) float32, PyTorch NCW layout. Returns (B, 3, 3)."""
    B, C, N = x_bcn.shape
    assert C == 3
    assert N % 8 == 0, "N must be a multiple of 8"
    assert 1024 % c3_chunk == 0
    (w1, b1, w2, b2, w3, b3, fw1, fb1, fw2, fb2, fw3p, fb3p) = params
    if bt is None:
        bt = _choose_bt(B, N)
    rows = bt * N

    # NCW -> (B*N, 3): channels on the lane axis, batch fused into the matmul M
    # dimension.  Kept f32 (no precision-losing bf16 cast of raw coordinates).
    x = jnp.transpose(x_bcn, (0, 2, 1)).reshape(B * N, C)

    grid_spec = pltpu.PrefetchScalarGridSpec(
        num_scalar_prefetch=0,
        grid=(B // bt,),
        in_specs=[
            pl.BlockSpec((rows, 3), lambda i: (i, 0)),
            _const_spec(w1.shape), _const_spec(b1.shape),
            _const_spec(w2.shape), _const_spec(b2.shape),
            _const_spec(w3.shape), _const_spec(b3.shape),
            _const_spec(fw1.shape), _const_spec(fb1.shape),
            _const_spec(fw2.shape), _const_spec(fb2.shape),
            _const_spec(fw3p.shape), _const_spec(fb3p.shape),
        ],
        out_specs=pl.BlockSpec((bt, 1, 128), lambda i: (i, 0, 0)),
        scratch_shapes=[pltpu.VMEM((bt, 1024), jnp.float32)],
    )
    out = pl.pallas_call(
        functools.partial(_stn3d_kernel, bt=bt, n=N, c3_chunk=c3_chunk),
        out_shape=jax.ShapeDtypeStruct((B, 1, 128), jnp.float32),
        grid_spec=grid_spec,
        compiler_params=pltpu.CompilerParams(
            dimension_semantics=("parallel",),
            vmem_limit_bytes=32 * 1024 * 1024),
    )(x, w1, b1, w2, b2, w3, b3, fw1, fb1, fw2, fb2, fw3p, fb3p)

    # lane-dense (B, 1, 128) slab -> the 9 real columns -> (B, 3, 3)
    return out[:, 0, :9].reshape(B, 3, 3)


# ----------------------------------------------------------------------------
# Parameter construction (deterministic, in-script) + BN folding glue.
# ----------------------------------------------------------------------------
def _fold_bn(w_io, b_o, gamma, beta, mean, var, eps=1e-5):
    """Fold eval-mode BatchNorm1d into (in, out) weight and (out,) bias."""
    scale = gamma / jnp.sqrt(var + eps)
    w_eff = w_io * scale[None, :]
    b_eff = (b_o - mean) * scale + beta
    return w_eff.astype(jnp.float32), b_eff.astype(jnp.float32)


def make_params(key):
    def nxt():
        nonlocal key
        key, sub = jax.random.split(key)
        return sub

    def lin(cin, cout, scale=0.05):
        w = jax.random.normal(nxt(), (cin, cout), jnp.float32) * scale  # (in,out)
        b = jax.random.normal(nxt(), (cout,), jnp.float32) * scale
        return w, b

    def bn(c):
        gamma = 1.0 + 0.1 * jax.random.normal(nxt(), (c,), jnp.float32)
        beta = 0.1 * jax.random.normal(nxt(), (c,), jnp.float32)
        mean = 0.1 * jax.random.normal(nxt(), (c,), jnp.float32)
        var = jnp.abs(1.0 + 0.1 * jax.random.normal(nxt(), (c,), jnp.float32))
        return gamma, beta, mean, var

    # conv1/2/3 are 1x1 Conv1d -> stored directly as (Cin, Cout) matmul weights
    w1, b1 = lin(3, 64)
    w2, b2 = lin(64, 128)
    w3, b3 = lin(128, 1024)
    fw1, fb1 = lin(1024, 512)
    fw2, fb2 = lin(512, 256)
    fw3, fb3 = lin(256, 9)
    # self.bias = nn.Parameter(torch.zeros(1, 3, 3)): zero-initialized but
    # learnable -> give it a small value so the add is exercised.  (This STN3d
    # spec adds ONLY self.bias; there is no flattened-identity add.)
    stn_bias = 0.01 * jax.random.normal(nxt(), (1, 3, 3), jnp.float32)

    w1, b1 = _fold_bn(w1, b1, *bn(64))        # conv1 + bn1
    w2, b2 = _fold_bn(w2, b2, *bn(128))       # conv2 + bn2
    w3, b3 = _fold_bn(w3, b3, *bn(1024))      # conv3 + bn3
    fw1, fb1 = _fold_bn(fw1, fb1, *bn(512))   # fc1 + bn4
    fw2, fb2 = _fold_bn(fw2, fb2, *bn(256))   # fc2 + bn5

    # fc3: fold the (1,3,3) bias add; pad to 128 output columns (lane-dense).
    fb3 = fb3 + stn_bias.reshape(9)
    fw3p = jnp.zeros((256, 128), jnp.float32).at[:, :9].set(fw3)
    fb3p = jnp.zeros((128,), jnp.float32).at[:9].set(fb3)

    to_bf16 = lambda a: a.astype(jnp.bfloat16)
    row = lambda b: b[None, :].astype(jnp.float32)   # biases kept f32, 2-D
    return (w1.astype(jnp.float32), row(b1),          # conv1 stays f32 (VPU path)
            to_bf16(w2), row(b2), to_bf16(w3), row(b3),
            to_bf16(fw1), row(fb1), to_bf16(fw2), row(fb2),
            to_bf16(fw3p), row(fb3p))


def reference_forward(x_bcn, params):
    """Plain-JAX reference mirroring the kernel's dtype path, in PyTorch op
    order (conv3 bias+relu BEFORE the max-pool; the kernel defers them, which
    is mathematically identical for a monotone relu and per-channel bias)."""
    (w1, b1, w2, b2, w3, b3, fw1, fb1, fw2, fb2, fw3p, fb3p) = params
    B, C, N = x_bcn.shape
    x = jnp.transpose(x_bcn, (0, 2, 1)).reshape(B * N, C)      # f32
    h = (x[:, 0:1] * w1[0:1, :] + x[:, 1:2] * w1[1:2, :]
         + x[:, 2:3] * w1[2:3, :] + b1)
    h = jax.nn.relu(h).astype(jnp.bfloat16)
    h = jax.nn.relu(jnp.dot(h, w2, preferred_element_type=jnp.float32) + b2
                    ).astype(jnp.bfloat16)
    h = jax.nn.relu(jnp.dot(h, w3, preferred_element_type=jnp.float32) + b3)
    g = jnp.max(h.reshape(B, N, 1024), axis=1).astype(jnp.bfloat16)
    f = jax.nn.relu(jnp.dot(g, fw1, preferred_element_type=jnp.float32) + fb1
                    ).astype(jnp.bfloat16)
    f = jax.nn.relu(jnp.dot(f, fw2, preferred_element_type=jnp.float32) + fb2
                    ).astype(jnp.bfloat16)
    o = jnp.dot(f, fw3p, preferred_element_type=jnp.float32) + fb3p
    return o[:, :9].reshape(B, 3, 3)


if __name__ == "__main__":
    key = jax.random.PRNGKey(0)
    kx, kp = jax.random.split(key)

    B, C, N = 2, 3, 16                       # small NCW point cloud (B, 3, N)
    x = jax.random.normal(kx, (B, C, N), jnp.float32)
    params = make_params(kp)

    out = stn3d_forward(x, params)
    out = jax.block_until_ready(out)

    ref = reference_forward(x, params)
    assert out.shape == (B, 3, 3)
    assert jnp.allclose(out, ref, atol=1e-3, rtol=1e-3), "mismatch vs reference"

    print("KERNEL_OK")
</pallas_src>

<mosaic_0001>
module attributes {stable_mosaic.version = 11 : i64} {
  func.func @_stn3d_kernel(%arg0: i32, %arg1: memref<16x3xf32, #tpu.memory_space<vmem>>, %arg2: memref<3x64xf32, #tpu.memory_space<vmem>>, %arg3: memref<1x64xf32, #tpu.memory_space<vmem>>, %arg4: memref<64x128xbf16, #tpu.memory_space<vmem>>, %arg5: memref<1x128xf32, #tpu.memory_space<vmem>>, %arg6: memref<128x1024xbf16, #tpu.memory_space<vmem>>, %arg7: memref<1x1024xf32, #tpu.memory_space<vmem>>, %arg8: memref<1024x512xbf16, #tpu.memory_space<vmem>>, %arg9: memref<1x512xf32, #tpu.memory_space<vmem>>, %arg10: memref<512x256xbf16, #tpu.memory_space<vmem>>, %arg11: memref<1x256xf32, #tpu.memory_space<vmem>>, %arg12: memref<256x128xbf16, #tpu.memory_space<vmem>>, %arg13: memref<1x128xf32, #tpu.memory_space<vmem>>, %arg14: memref<1x1x128xf32, #tpu.memory_space<vmem>>, %arg15: memref<1x1024xf32, #tpu.memory_space<vmem>>) attributes {dimension_semantics = [#tpu.dimension_semantics<parallel>], iteration_bounds = array<i64: 2>, scalar_prefetch = 0 : i64, scratch_operands = 1 : i64, tpu.core_type = #tpu.core_type<tc>, window_params = [{transform_indices = @transform_0, window_bounds = array<i64: 16, 3>}, {pipeline_mode = #tpu.pipeline_mode<synchronous>, transform_indices = @transform_1, window_bounds = array<i64: 3, 64>}, {pipeline_mode = #tpu.pipeline_mode<synchronous>, transform_indices = @transform_2, window_bounds = array<i64: 1, 64>}, {pipeline_mode = #tpu.pipeline_mode<synchronous>, transform_indices = @transform_3, window_bounds = array<i64: 64, 128>}, {pipeline_mode = #tpu.pipeline_mode<synchronous>, transform_indices = @transform_4, window_bounds = array<i64: 1, 128>}, {pipeline_mode = #tpu.pipeline_mode<synchronous>, transform_indices = @transform_5, window_bounds = array<i64: 128, 1024>}, {pipeline_mode = #tpu.pipeline_mode<synchronous>, transform_indices = @transform_6, window_bounds = array<i64: 1, 1024>}, {pipeline_mode = #tpu.pipeline_mode<synchronous>, transform_indices = @transform_7, window_bounds = array<i64: 1024, 512>}, {pipeline_mode = #tpu.pipeline_mode<synchronous>, transform_indices = @transform_8, window_bounds = array<i64: 1, 512>}, {pipeline_mode = #tpu.pipeline_mode<synchronous>, transform_indices = @transform_9, window_bounds = array<i64: 512, 256>}, {pipeline_mode = #tpu.pipeline_mode<synchronous>, transform_indices = @transform_10, window_bounds = array<i64: 1, 256>}, {pipeline_mode = #tpu.pipeline_mode<synchronous>, transform_indices = @transform_11, window_bounds = array<i64: 256, 128>}, {pipeline_mode = #tpu.pipeline_mode<synchronous>, transform_indices = @transform_12, window_bounds = array<i64: 1, 128>}, {transform_indices = @transform_13, window_bounds = array<i64: 1, 1, 128>}]} {
    %c0 = arith.constant 0 : index
    %c0_0 = arith.constant 0 : index
    %0 = vector.load %arg1[%c0, %c0_0] : memref<16x3xf32, #tpu.memory_space<vmem>>, vector<16x3xf32>
    %c0_1 = arith.constant 0 : index
    %c0_2 = arith.constant 0 : index
    %1 = vector.load %arg2[%c0_1, %c0_2] : memref<3x64xf32, #tpu.memory_space<vmem>>, vector<3x64xf32>
    %2 = vector.extract_strided_slice %0 {offsets = [0, 0], sizes = [16, 1], strides = [1, 1]} : vector<16x3xf32> to vector<16x1xf32>
    %3 = vector.extract_strided_slice %1 {offsets = [0, 0], sizes = [1, 64], strides = [1, 1]} : vector<3x64xf32> to vector<1x64xf32>
    %4 = vector.broadcast %2 : vector<16x1xf32> to vector<16x64xf32>
    %5 = vector.broadcast %3 : vector<1x64xf32> to vector<16x64xf32>
    %6 = arith.mulf %4, %5 : vector<16x64xf32>
    %7 = vector.extract_strided_slice %0 {offsets = [0, 1], sizes = [16, 1], strides = [1, 1]} : vector<16x3xf32> to vector<16x1xf32>
    %8 = vector.extract_strided_slice %1 {offsets = [1, 0], sizes = [1, 64], strides = [1, 1]} : vector<3x64xf32> to vector<1x64xf32>
    %9 = vector.broadcast %7 : vector<16x1xf32> to vector<16x64xf32>
    %10 = vector.broadcast %8 : vector<1x64xf32> to vector<16x64xf32>
    %11 = arith.mulf %9, %10 : vector<16x64xf32>
    %12 = arith.addf %6, %11 : vector<16x64xf32>
    %13 = vector.extract_strided_slice %0 {offsets = [0, 2], sizes = [16, 1], strides = [1, 1]} : vector<16x3xf32> to vector<16x1xf32>
    %14 = vector.extract_strided_slice %1 {offsets = [2, 0], sizes = [1, 64], strides = [1, 1]} : vector<3x64xf32> to vector<1x64xf32>
    %15 = vector.broadcast %13 : vector<16x1xf32> to vector<16x64xf32>
    %16 = vector.broadcast %14 : vector<1x64xf32> to vector<16x64xf32>
    %17 = arith.mulf %15, %16 : vector<16x64xf32>
    %18 = arith.addf %12, %17 : vector<16x64xf32>
    %c0_3 = arith.constant 0 : index
    %c0_4 = arith.constant 0 : index
    %19 = vector.load %arg3[%c0_3, %c0_4] : memref<1x64xf32, #tpu.memory_space<vmem>>, vector<1x64xf32>
    %20 = vector.broadcast %19 : vector<1x64xf32> to vector<16x64xf32>
    %21 = arith.addf %18, %20 : vector<16x64xf32>
    %cst = arith.constant 0.000000e+00 : f32
    %22 = vector.broadcast %cst : f32 to vector<16x64xf32>
    %23 = arith.maximumf %21, %22 : vector<16x64xf32>
    %24 = arith.truncf %23 : vector<16x64xf32> to vector<16x64xbf16>
    %c0_5 = arith.constant 0 : index
    %c0_6 = arith.constant 0 : index
    %25 = vector.load %arg4[%c0_5, %c0_6] : memref<64x128xbf16, #tpu.memory_space<vmem>>, vector<64x128xbf16>
    %cst_7 = arith.constant dense<0.000000e+00> : vector<16x128xf32>
    %26 = tpu.matmul %24, %25, %cst_7 {dimension_numbers = #tpu.dot_dimension_numbers<[1], [0], [0], [1], [0, 0, 1, 1], [], []>} : vector<16x64xbf16>, vector<64x128xbf16>, vector<16x128xf32> -> vector<16x128xf32>
    %c0_8 = arith.constant 0 : index
    %c0_9 = arith.constant 0 : index
    %27 = vector.load %arg5[%c0_8, %c0_9] : memref<1x128xf32, #tpu.memory_space<vmem>>, vector<1x128xf32>
    %28 = vector.broadcast %27 : vector<1x128xf32> to vector<16x128xf32>
    %29 = arith.addf %26, %28 : vector<16x128xf32>
    %cst_10 = arith.constant 0.000000e+00 : f32
    %30 = vector.broadcast %cst_10 : f32 to vector<16x128xf32>
    %31 = arith.maximumf %29, %30 : vector<16x128xf32>
    %32 = arith.truncf %31 : vector<16x128xf32> to vector<16x128xbf16>
    %c0_11 = arith.constant 0 : index
    %c0_12 = arith.constant 0 : index
    %33 = vector.load %arg6[%c0_11, %c0_12] : memref<128x1024xbf16, #tpu.memory_space<vmem>>, vector<128x256xbf16>
    %cst_13 = arith.constant dense<0.000000e+00> : vector<16x256xf32>
    %34 = tpu.matmul %32, %33, %cst_13 {dimension_numbers = #tpu.dot_dimension_numbers<[1], [0], [0], [1], [0, 0, 1, 1], [], []>} : vector<16x128xbf16>, vector<128x256xbf16>, vector<16x256xf32> -> vector<16x256xf32>
    %35 = vector.shape_cast %34 : vector<16x256xf32> to vector<1x16x256xf32>
    %cst_14 = arith.constant dense<0xFF800000> : vector<1x256xf32>
    %36 = vector.multi_reduction <maximumf>, %35, %cst_14 [1] : vector<1x16x256xf32> to vector<1x256xf32>
    %c0_15 = arith.constant 0 : index
    %c0_16 = arith.constant 0 : index
    %37 = vector.load %arg15[%c0_15, %c0_16] : memref<1x1024xf32, #tpu.memory_space<vmem>>, vector<1x256xf32>
    tpu.vector_store %arg15[%c0_15, %c0_16], %36 {strides = array<i32>} : memref<1x1024xf32, #tpu.memory_space<vmem>>, vector<1x256xf32>,
    %c0_17 = arith.constant 0 : index
    %c256 = arith.constant 256 : index
    %38 = vector.load %arg6[%c0_17, %c256] : memref<128x1024xbf16, #tpu.memory_space<vmem>>, vector<128x256xbf16>
    %cst_18 = arith.constant dense<0.000000e+00> : vector<16x256xf32>
    %39 = tpu.matmul %32, %38, %cst_18 {dimension_numbers = #tpu.dot_dimension_numbers<[1], [0], [0], [1], [0, 0, 1, 1], [], []>} : vector<16x128xbf16>, vector<128x256xbf16>, vector<16x256xf32> -> vector<16x256xf32>
    %40 = vector.shape_cast %39 : vector<16x256xf32> to vector<1x16x256xf32>
    %cst_19 = arith.constant dense<0xFF800000> : vector<1x256xf32>
    %41 = vector.multi_reduction <maximumf>, %40, %cst_19 [1] : vector<1x16x256xf32> to vector<1x256xf32>
    %c0_20 = arith.constant 0 : index
    %c256_21 = arith.constant 256 : index
    %42 = vector.load %arg15[%c0_20, %c256_21] : memref<1x1024xf32, #tpu.memory_space<vmem>>, vector<1x256xf32>
    tpu.vector_store %arg15[%c0_20, %c256_21], %41 {strides = array<i32>} : memref<1x1024xf32, #tpu.memory_space<vmem>>, vector<1x256xf32>,
    %c0_22 = arith.constant 0 : index
    %c512 = arith.constant 512 : index
    %43 = vector.load %arg6[%c0_22, %c512] : memref<128x1024xbf16, #tpu.memory_space<vmem>>, vector<128x256xbf16>
    %cst_23 = arith.constant dense<0.000000e+00> : vector<16x256xf32>
    %44 = tpu.matmul %32, %43, %cst_23 {dimension_numbers = #tpu.dot_dimension_numbers<[1], [0], [0], [1], [0, 0, 1, 1], [], []>} : vector<16x128xbf16>, vector<128x256xbf16>, vector<16x256xf32> -> vector<16x256xf32>
    %45 = vector.shape_cast %44 : vector<16x256xf32> to vector<1x16x256xf32>
    %cst_24 = arith.constant dense<0xFF800000> : vector<1x256xf32>
    %46 = vector.multi_reduction <maximumf>, %45, %cst_24 [1] : vector<1x16x256xf32> to vector<1x256xf32>
    %c0_25 = arith.constant 0 : index
    %c512_26 = arith.constant 512 : index
    %47 = vector.load %arg15[%c0_25, %c512_26] : memref<1x1024xf32, #tpu.memory_space<vmem>>, vector<1x256xf32>
    tpu.vector_store %arg15[%c0_25, %c512_26], %46 {strides = array<i32>} : memref<1x1024xf32, #tpu.memory_space<vmem>>, vector<1x256xf32>,
    %c0_27 = arith.constant 0 : index
    %c768 = arith.constant 768 : index
    %48 = vector.load %arg6[%c0_27, %c768] : memref<128x1024xbf16, #tpu.memory_space<vmem>>, vector<128x256xbf16>
    %cst_28 = arith.constant dense<0.000000e+00> : vector<16x256xf32>
    %49 = tpu.matmul %32, %48, %cst_28 {dimension_numbers = #tpu.dot_dimension_numbers<[1], [0], [0], [1], [0, 0, 1, 1], [], []>} : vector<16x128xbf16>, vector<128x256xbf16>, vector<16x256xf32> -> vector<16x256xf32>
    %50 = vector.shape_cast %49 : vector<16x256xf32> to vector<1x16x256xf32>
    %cst_29 = arith.constant dense<0xFF800000> : vector<1x256xf32>
    %51 = vector.multi_reduction <maximumf>, %50, %cst_29 [1] : vector<1x16x256xf32> to vector<1x256xf32>
    %c0_30 = arith.constant 0 : index
    %c768_31 = arith.constant 768 : index
    %52 = vector.load %arg15[%c0_30, %c768_31] : memref<1x1024xf32, #tpu.memory_space<vmem>>, vector<1x256xf32>
    tpu.vector_store %arg15[%c0_30, %c768_31], %51 {strides = array<i32>} : memref<1x1024xf32, #tpu.memory_space<vmem>>, vector<1x256xf32>,
    %c0_32 = arith.constant 0 : index
    %c0_33 = arith.constant 0 : index
    %53 = vector.load %arg15[%c0_32, %c0_33] : memref<1x1024xf32, #tpu.memory_space<vmem>>, vector<1x1024xf32>
    %c0_34 = arith.constant 0 : index
    %c0_35 = arith.constant 0 : index
    %54 = vector.load %arg7[%c0_34, %c0_35] : memref<1x1024xf32, #tpu.memory_space<vmem>>, vector<1x1024xf32>
    %55 = arith.addf %53, %54 : vector<1x1024xf32>
    %cst_36 = arith.constant 0.000000e+00 : f32
    %56 = vector.broadcast %cst_36 : f32 to vector<1x1024xf32>
    %57 = arith.maximumf %55, %56 : vector<1x1024xf32>
    %58 = arith.truncf %57 : vector<1x1024xf32> to vector<1x1024xbf16>
    %c0_37 = arith.constant 0 : index
    %c0_38 = arith.constant 0 : index
    %59 = vector.load %arg8[%c0_37, %c0_38] : memref<1024x512xbf16, #tpu.memory_space<vmem>>, vector<1024x512xbf16>
    %cst_39 = arith.constant dense<0.000000e+00> : vector<1x512xf32>
    %60 = tpu.matmul %58, %59, %cst_39 {dimension_numbers = #tpu.dot_dimension_numbers<[1], [0], [0], [1], [0, 0, 1, 1], [], []>} : vector<1x1024xbf16>, vector<1024x512xbf16>, vector<1x512xf32> -> vector<1x512xf32>
    %c0_40 = arith.constant 0 : index
    %c0_41 = arith.constant 0 : index
    %61 = vector.load %arg9[%c0_40, %c0_41] : memref<1x512xf32, #tpu.memory_space<vmem>>, vector<1x512xf32>
    %62 = arith.addf %60, %61 : vector<1x512xf32>
    %cst_42 = arith.constant 0.000000e+00 : f32
    %63 = vector.broadcast %cst_42 : f32 to vector<1x512xf32>
    %64 = arith.maximumf %62, %63 : vector<1x512xf32>
    %65 = arith.truncf %64 : vector<1x512xf32> to vector<1x512xbf16>
    %c0_43 = arith.constant 0 : index
    %c0_44 = arith.constant 0 : index
    %66 = vector.load %arg10[%c0_43, %c0_44] : memref<512x256xbf16, #tpu.memory_space<vmem>>, vector<512x256xbf16>
    %cst_45 = arith.constant dense<0.000000e+00> : vector<1x256xf32>
    %67 = tpu.matmul %65, %66, %cst_45 {dimension_numbers = #tpu.dot_dimension_numbers<[1], [0], [0], [1], [0, 0, 1, 1], [], []>} : vector<1x512xbf16>, vector<512x256xbf16>, vector<1x256xf32> -> vector<1x256xf32>
    %c0_46 = arith.constant 0 : index
    %c0_47 = arith.constant 0 : index
    %68 = vector.load %arg11[%c0_46, %c0_47] : memref<1x256xf32, #tpu.memory_space<vmem>>, vector<1x256xf32>
    %69 = arith.addf %67, %68 : vector<1x256xf32>
    %cst_48 = arith.constant 0.000000e+00 : f32
    %70 = vector.broadcast %cst_48 : f32 to vector<1x256xf32>
    %71 = arith.maximumf %69, %70 : vector<1x256xf32>
    %72 = arith.truncf %71 : vector<1x256xf32> to vector<1x256xbf16>
    %c0_49 = arith.constant 0 : index
    %c0_50 = arith.constant 0 : index
    %73 = vector.load %arg12[%c0_49, %c0_50] : memref<256x128xbf16, #tpu.memory_space<vmem>>, vector<256x128xbf16>
    %cst_51 = arith.constant dense<0.000000e+00> : vector<1x128xf32>
    %74 = tpu.matmul %72, %73, %cst_51 {dimension_numbers = #tpu.dot_dimension_numbers<[1], [0], [0], [1], [0, 0, 1, 1], [], []>} : vector<1x256xbf16>, vector<256x128xbf16>, vector<1x128xf32> -> vector<1x128xf32>
    %c0_52 = arith.constant 0 : index
    %c0_53 = arith.constant 0 : index
    %75 = vector.load %arg13[%c0_52, %c0_53] : memref<1x128xf32, #tpu.memory_space<vmem>>, vector<1x128xf32>
    %76 = arith.addf %74, %75 : vector<1x128xf32>
    %77 = vector.shape_cast %76 : vector<1x128xf32> to vector<1x1x128xf32>
    %c0_54 = arith.constant 0 : index
    %c0_55 = arith.constant 0 : index
    %c0_56 = arith.constant 0 : index
    %78 = vector.load %arg14[%c0_54, %c0_55, %c0_56] : memref<1x1x128xf32, #tpu.memory_space<vmem>>, vector<1x1x128xf32>
    tpu.vector_store %arg14[%c0_54, %c0_55, %c0_56], %77 {strides = array<i32>} : memref<1x1x128xf32, #tpu.memory_space<vmem>>, vector<1x1x128xf32>,
    return
  }
  func.func @transform_0(%arg0: i32) -> (i32, i32) {
    %c0_i32 = arith.constant 0 : i32
    %c0_i32_0 = arith.constant 0 : i32
    return %arg0, %c0_i32 : i32, i32
  }
  func.func @transform_1(%arg0: i32) -> (i32, i32) {
    %c0_i32 = arith.constant 0 : i32
    %c0_i32_0 = arith.constant 0 : i32
    %c0_i32_1 = arith.constant 0 : i32
    return %c0_i32, %c0_i32_0 : i32, i32
  }
  func.func @transform_2(%arg0: i32) -> (i32, i32) {
    %c0_i32 = arith.constant 0 : i32
    %c0_i32_0 = arith.constant 0 : i32
    %c0_i32_1 = arith.constant 0 : i32
    return %c0_i32, %c0_i32_0 : i32, i32
  }
  func.func @transform_3(%arg0: i32) -> (i32, i32) {
    %c0_i32 = arith.constant 0 : i32
    %c0_i32_0 = arith.constant 0 : i32
    %c0_i32_1 = arith.constant 0 : i32
    return %c0_i32, %c0_i32_0 : i32, i32
  }
  func.func @transform_4(%arg0: i32) -> (i32, i32) {
    %c0_i32 = arith.constant 0 : i32
    %c0_i32_0 = arith.constant 0 : i32
    %c0_i32_1 = arith.constant 0 : i32
    return %c0_i32, %c0_i32_0 : i32, i32
  }
  func.func @transform_5(%arg0: i32) -> (i32, i32) {
    %c0_i32 = arith.constant 0 : i32
    %c0_i32_0 = arith.constant 0 : i32
    %c0_i32_1 = arith.constant 0 : i32
    return %c0_i32, %c0_i32_0 : i32, i32
  }
  func.func @transform_6(%arg0: i32) -> (i32, i32) {
    %c0_i32 = arith.constant 0 : i32
    %c0_i32_0 = arith.constant 0 : i32
    %c0_i32_1 = arith.constant 0 : i32
    return %c0_i32, %c0_i32_0 : i32, i32
  }
  func.func @transform_7(%arg0: i32) -> (i32, i32) {
    %c0_i32 = arith.constant 0 : i32
    %c0_i32_0 = arith.constant 0 : i32
    %c0_i32_1 = arith.constant 0 : i32
    return %c0_i32, %c0_i32_0 : i32, i32
  }
  func.func @transform_8(%arg0: i32) -> (i32, i32) {
    %c0_i32 = arith.constant 0 : i32
    %c0_i32_0 = arith.constant 0 : i32
    %c0_i32_1 = arith.constant 0 : i32
    return %c0_i32, %c0_i32_0 : i32, i32
  }
  func.func @transform_9(%arg0: i32) -> (i32, i32) {
    %c0_i32 = arith.constant 0 : i32
    %c0_i32_0 = arith.constant 0 : i32
    %c0_i32_1 = arith.constant 0 : i32
    return %c0_i32, %c0_i32_0 : i32, i32
  }
  func.func @transform_10(%arg0: i32) -> (i32, i32) {
    %c0_i32 = arith.constant 0 : i32
    %c0_i32_0 = arith.constant 0 : i32
    %c0_i32_1 = arith.constant 0 : i32
    return %c0_i32, %c0_i32_0 : i32, i32
  }
  func.func @transform_11(%arg0: i32) -> (i32, i32) {
    %c0_i32 = arith.constant 0 : i32
    %c0_i32_0 = arith.constant 0 : i32
    %c0_i32_1 = arith.constant 0 : i32
    return %c0_i32, %c0_i32_0 : i32, i32
  }
  func.func @transform_12(%arg0: i32) -> (i32, i32) {
    %c0_i32 = arith.constant 0 : i32
    %c0_i32_0 = arith.constant 0 : i32
    %c0_i32_1 = arith.constant 0 : i32
    return %c0_i32, %c0_i32_0 : i32, i32
  }
  func.func @transform_13(%arg0: i32) -> (i32, i32, i32) {
    %c0_i32 = arith.constant 0 : i32
    %c0_i32_0 = arith.constant 0 : i32
    %c0_i32_1 = arith.constant 0 : i32
    return %arg0, %c0_i32, %c0_i32_0 : i32, i32, i32
  }
}

</mosaic_0001>

<bundles_post_ra>
// kernel: tpu_custom_call.1
= control target key start
LH: loop header
LB: loop body
LE: loop exit
PB: predicated region body
PF: predicated region fallthrough
CT: control target
= control target key end

     0   :  { %s5837_s0 = inlined_call_operand.vmem [shape: f32[32,3], index: 0, kind: input, shape index: {}]   ;;  %s5838_s1 = inlined_call_operand.vmem [shape: f32[3,64], index: 1, kind: input, shape index: {}]   ;;  %s5839_s2 = inlined_call_operand.vmem [shape: f32[1,64], index: 2, kind: input, shape index: {}]   ;;  %s5840_s3 = inlined_call_operand.vmem [shape: bf16[64,128], index: 3, kind: input, shape index: {}]   ;;  %s5841_s4 = inlined_call_operand.hbm [shape: f32[1,128], index: 4, kind: input, shape index: {}]   ;;  %s5842_s5 = inlined_call_operand.hbm [shape: bf16[128,1024], index: 5, kind: input, shape index: {}]   ;;  %s5843_s6 = inlined_call_operand.vmem [shape: f32[1,1024], index: 6, kind: input, shape index: {}]   ;;  %s5844_s7 = inlined_call_operand.hbm [shape: bf16[1024,512], index: 7, kind: input, shape index: {}]   ;;  %s5845_s8 = inlined_call_operand.vmem [shape: f32[1,512], index: 8, kind: input, shape index: {}]   ;;  %s5846_s9 = inlined_call_operand.hbm [shape: bf16[512,256], index: 9, kind: input, shape index: {}]   ;;  %s5847_s10 = inlined_call_operand.vmem [shape: f32[1,256], index: 10, kind: input, shape index: {}]   ;;  %s5848_s11 = inlined_call_operand.hbm [shape: bf16[256,128], index: 11, kind: input, shape index: {}]   ;;  %s5849_s12 = inlined_call_operand.vmem [shape: f32[1,128], index: 12, kind: input, shape index: {}]   ;;  %s5850_s13 = inlined_call_operand.hbm [shape: f32[2,1,128], index: 13, kind: output, shape index: {}]  }
   0x1   :  { %5863 = sst [smem:[#allocation24_spill]] %s5842_s5 }
   0x2   :  { %5864 = sst [smem:[#allocation25_spill]] %s5850_s13 }
   0x3   :  { %18 = vsyncpa [#allocation4], 0 }
   0x4   :  { %19 = vsyncpa [#allocation7], 0 }
   0x5   :  { %20 = vsyncpa [#allocation10], 0 }
   0x6   :  { %21 = vsyncpa [#allocation5], 0 }
   0x7   :  { %23 = vsyncpa [#allocation5 + $0x1], 0  ;;  %s5484_s25 = smov 0   ;;  %s5486_s26 = smov 0  }
   0x8   :  { %s5488_s27 = smov 0   ;;  %s5490_s28 = smov 0  }
   0x9 LB: > { %5865 = sst [smem:[#allocation17_spill]] %s5380_s25  ;;  %s5505_s29 = sadd.s32 4294967295, %s5392_s28   ;;  %s5392_s28 = sphi %s5490_s28, %s5895_s28   ;;  %s5388_s27 = sphi %s5488_s27, %s5897_s27   ;;  %s5384_s26 = sphi %s5486_s26, %s5899_s26   ;;  %s5380_s25 = sphi %s5484_s25, %s5898_s25  }
   0xa   : > { %5866 = sst [smem:[#allocation18_spill]] %s5388_s27  ;;  %s4071_s30 = sadd.s32 4294967294, %s5392_s28  }
   0xb   : > { %5867 = sst [smem:[#allocation19_spill]] %s5392_s28  ;;  %s5509_s14 = sadd.s32 1, %s5392_s28  }
   0xc   : > { %5868 = sst [smem:[#allocation20_spill]] %s5509_s14  ;;  %s314_s15 = sadd.s32 1, %s5388_s27 }
   0xd   : > { %s311_s16 = ssub.s32 %s5392_s28, %s5509_s14  ;;  %p324_p0 = scmp.ne.s32.totalorder %s5388_s27, %s5384_s26 }
   0xe   : > { %p312_p1 = scmp.eq.s32.totalorder %s311_s16, 0  ;;  %p325_p2 = scmp.eq.s32.totalorder %s5505_s29, 1 }
   0xf   : > { %p330_p3 = scmp.ne.s32.totalorder %s5384_s26, %s5380_s25  ;;  %p331_p4 = scmp.eq.s32.totalorder %s4071_s30, 1 }
  0x10   : > { %s5520_s17 = scalar_select %p312_p1, %s5388_s27, %s314_s15  }
  0x11   : > { %p5522_p5 = por %p325_p2, %p324_p0  ;;  %p5526_p6 = por %p331_p4, %p330_p3 }
  0x12   : > { %5869 = sst [smem:[#allocation21_spill]] %s5520_s17  ;;  %p4072_p7 = scmp.ge.s32.totalorder %s5392_s28, 1 }
  0x13   : > { %s5870_s18 = scalar_select %p5522_p5, 1, 0 }
  0x14   : > { %s5872_s19 = scalar_select %p5526_p6, 1, 0 }
  0x15   : > { %5871 = sst [smem:[#allocation22_spill]] %s5870_s18  ;;  %p338_p8 = scmp.lt.s32.totalorder %s5392_s28, 3 }
  0x16   : > { %5873 = sst [smem:[#allocation23_spill]] %s5872_s19  ;;  %p5855_p9 = scmp.eq.s32.totalorder %s5505_s29, 0 }
  0x17   : > { %p5533_p10 = pnand %p4072_p7, %p338_p8  ;;  %s5394_s21 = smov [#allocation6]  }
  0x18   : > { %s370_s22 = sshll.u32 %s5394_s21, 4  ;;  %s5395_s24 = smov [#allocation9]   ;;  %s371_s22 = int_to_ptr.vmem [resolvable:$true] %s370_s22 }
  0x19   : > { %s5874_s20 = scalar_select %p5533_p10, 1, 0 }
  0x1a   : > { %p4592_p11 = pneg %p5533_p10  ;;  %s402_s30 = sshll.u32 %s5395_s24, 4  ;;  %s5545_s30 = int_to_ptr.vmem [resolvable:$true] %s402_s30 }
  0x1b   : > { %s5876_s5 = sld [smem:[#allocation24_spill]] }
  0x1c   : > { %p5541_p12 = pnand %p5855_p9, %p4592_p11 }
  0x1e   : > { %p5555_p0 = pneg %p5541_p12 }
  0x21   : > { %s5178_s17 = scalar_lea.hbm %s5876_s5, 8192 }
  0x22   : > { %p5179_p13 = scmp.ne.s32.totalorder %s5876_s5, %s5178_s17  ;;  %p5185_p3 = scmp.lt.u32.totalorder %s5178_s17, %s5876_s5 }
  0x24   : > { %p5181_p1 = pnand %p5555_p0, %p5179_p13 }
  0x26   : > { %p5182_p2 = pneg %p5181_p1 }
  0x28   : > { %p5187_p4 = pnand %p5185_p3, %p5182_p2 }
  0x2a   : > { %5190 = shalt.err (!%p5187_p4)
}
  0x2b   : > { %s5191_s15 = scalar_lea.vmem %s371_s22, 8192  ;;  %p5199_p9 = scmp.lt.s32.totalorder %s371_s22, %s371_s22 }
  0x2c   : > { %p5192_p7 = scmp.ne.s32.totalorder %s371_s22, %s5191_s15  ;;  %p5200_p6 = scmp.lt.s32.totalorder %s5191_s15, %s5191_s15 }
  0x2e   : > { %p5194_p8 = pnand %p5192_p7, %p5555_p0  ;;  %p5201_p5 = por %p5200_p6, %p5199_p9 }
  0x30   : > { %p5195_p11 = pneg %p5194_p8 }
  0x32   : > { %p5202_p10 = pnand %p5201_p5, %p5195_p11 }
  0x34   : > { %5205 = shalt.err (!%p5202_p10)
}
  0x35   : > { %s5396_s27 = smov 512   ;;  %s5397_s14 = smov 32  }
  0x36   : > { %4598 = dma.hbm_to_vmem [thread:$0]  (!%p5541_p12), %s5876_s5, 8192, %s371_s22, [#allocation7], %s5396_s27, %s5396_s27, %s5397_s14  }
  0x37   : > { %s5206_s25 = scalar_lea.hbm %s5846_s9, 8192 }
  0x38   : > { %p5207_p13 = scmp.ne.s32.totalorder %s5846_s9, %s5206_s25  ;;  %p5213_p9 = scmp.lt.u32.totalorder %s5206_s25, %s5846_s9 }
  0x3a   : > { %p5209_p5 = pnand %p5207_p13, %p5555_p0 }
  0x3c   : > { %p5210_p6 = pneg %p5209_p5 }
  0x3e   : > { %p5215_p10 = pnand %p5213_p9, %p5210_p6 }
  0x40   : > { %5218 = shalt.err (!%p5215_p10)
}
  0x41   : > { %s5219_s22 = scalar_lea.vmem %s5545_s30, 8192  ;;  %p5227_p4 = scmp.lt.s32.totalorder %s5545_s30, %s5545_s30 }
  0x42   : > { %p5220_p1 = scmp.ne.s32.totalorder %s5545_s30, %s5219_s22  ;;  %p5228_p7 = scmp.lt.s32.totalorder %s5219_s22, %s5219_s22 }
  0x44   : > { %p5222_p2 = pnand %p5220_p1, %p5555_p0  ;;  %p5229_p8 = por %p5228_p7, %p5227_p4 }
  0x46   : > { %p5223_p3 = pneg %p5222_p2 }
  0x48   : > { %p5230_p11 = pnand %p5229_p8, %p5223_p3 }
  0x4a   : > { %5233 = shalt.err (!%p5230_p11)
}
  0x4b   : > { %s5398_s13 = smov 128   ;;  %s5399_s25 = smov 8  }
  0x4c   : > { %4604 = dma.hbm_to_vmem [thread:$0]  (!%p5541_p12), %s5846_s9, 8192, %s5545_s30, [#allocation10], %s5398_s13, %s5398_s13, %s5399_s25  }
  0x4d   : > { %s5400_s27 = smov [#allocation3]   ;;  %s5401_s19 = smov [#allocation8]  }
  0x4e   : > { %s360_s14 = sshll.u32 %s5400_s27, 4  ;;  %s386_s17 = sshll.u32 %s5401_s19, 4  ;;  %s361_s14 = int_to_ptr.vmem [resolvable:$true] %s360_s14  ;;  %s5594_s17 = int_to_ptr.vmem [resolvable:$true] %s386_s17 }
  0x4f   : > { %s5234_s15 = scalar_lea.hbm %s5841_s4, 16 }
  0x50   : > { %p5235_p13 = scmp.ne.s32.totalorder %s5841_s4, %s5234_s15  ;;  %p5241_p9 = scmp.lt.u32.totalorder %s5234_s15, %s5841_s4 }
  0x52   : > { %p5237_p5 = pnand %p5235_p13, %p5555_p0 }
  0x54   : > { %p5238_p6 = pneg %p5237_p5 }
  0x56   : > { %p5243_p10 = pnand %p5241_p9, %p5238_p6 }
  0x58   : > { %5246 = shalt.err (!%p5243_p10)
}
  0x59   : > { %s5247_s13 = scalar_lea.vmem %s361_s14, 16  ;;  %s5254_s25 = scalar_lea.vmem %s361_s14, 32 }
  0x5a   : > { %p5248_p1 = scmp.ne.s32.totalorder %s361_s14, %s5247_s13  ;;  %p5255_p4 = scmp.lt.s32.totalorder %s361_s14, %s361_s14 }
  0x5b   : > { %p5256_p7 = scmp.lt.s32.totalorder %s5254_s25, %s5247_s13 }
  0x5c   : > { %p5250_p2 = pnand %p5248_p1, %p5555_p0 }
  0x5d   : > { %p5257_p8 = por %p5256_p7, %p5255_p4 }
  0x5e   : > { %p5251_p3 = pneg %p5250_p2 }
  0x60   : > { %p5258_p11 = pnand %p5257_p8, %p5251_p3 }
  0x62   : > { %5261 = shalt.err (!%p5258_p11)
}
  0x63   : > { %4595 = dma.hbm_to_vmem [thread:$0]  (!%p5541_p12), %s5841_s4, 16, %s361_s14, [#allocation4]  }
  0x64   : > { %s5262_s16 = scalar_lea.hbm %s5844_s7, 32768 }
  0x65   : > { %p5263_p13 = scmp.ne.s32.totalorder %s5844_s7, %s5262_s16  ;;  %p5269_p9 = scmp.lt.u32.totalorder %s5262_s16, %s5844_s7 }
  0x67   : > { %p5265_p5 = pnand %p5263_p13, %p5555_p0 }
  0x69   : > { %p5266_p6 = pneg %p5265_p5 }
  0x6b   : > { %p5271_p10 = pnand %p5269_p9, %p5266_p6 }
  0x6d   : > { %5274 = shalt.err (!%p5271_p10)
}
  0x6e   : > { %s5275_s14 = scalar_lea.vmem %s5594_s17, 32768  ;;  %p5283_p4 = scmp.lt.s32.totalorder %s5594_s17, %s5594_s17 }
  0x6f   : > { %p5276_p1 = scmp.ne.s32.totalorder %s5594_s17, %s5275_s14  ;;  %p5284_p7 = scmp.lt.s32.totalorder %s5275_s14, %s5275_s14 }
  0x71   : > { %p5278_p2 = pnand %p5276_p1, %p5555_p0  ;;  %p5285_p8 = por %p5284_p7, %p5283_p4 }
  0x73   : > { %p5279_p3 = pneg %p5278_p2 }
  0x75   : > { %p5286_p11 = pnand %p5285_p8, %p5279_p3 }
  0x77   : > { %5289 = shalt.err (!%p5286_p11)
}
  0x78   : > { %s5402_s30 = smov 256   ;;  %s5403_s13 = smov 16  }
  0x79   : > { %4601 = dma.hbm_to_vmem [thread:$0]  (!%p5541_p12), %s5844_s7, 32768, %s5594_s17, [#allocation7], %s5402_s30, %s5402_s30, %s5403_s13  }
  0x7a   : > { %s5404_s18 = smov [#allocation11]   ;;  %s5290_s24 = scalar_lea.hbm %s5848_s11, 2048 }
  0x7b   : > { %s418_s27 = sshll.u32 %s5404_s18, 4  ;;  %p5291_p13 = scmp.ne.s32.totalorder %s5848_s11, %s5290_s24  ;;  %s419_s27 = int_to_ptr.vmem [resolvable:$true] %s418_s27 }
  0x7c   : > { %p5297_p9 = scmp.lt.u32.totalorder %s5290_s24, %s5848_s11 }
  0x7d   : > { %p5293_p5 = pnand %p5291_p13, %p5555_p0 }
  0x7f   : > { %p5294_p6 = pneg %p5293_p5 }
  0x81   : > { %p5299_p10 = pnand %p5297_p9, %p5294_p6 }
  0x83   : > { %5302 = shalt.err (!%p5299_p10)
}
  0x84   : > { %s5303_s17 = scalar_lea.vmem %s419_s27, 2048  ;;  %p5311_p4 = scmp.lt.s32.totalorder %s419_s27, %s419_s27 }
  0x85   : > { %p5304_p1 = scmp.ne.s32.totalorder %s419_s27, %s5303_s17  ;;  %p5312_p7 = scmp.lt.s32.totalorder %s5303_s17, %s5303_s17 }
  0x87   : > { %p5306_p2 = pnand %p5304_p1, %p5555_p0  ;;  %p5313_p8 = por %p5312_p7, %p5311_p4 }
  0x89   : > { %p5307_p3 = pneg %p5306_p2 }
  0x8b   : > { %p5314_p11 = pnand %p5313_p8, %p5307_p3 }
  0x8d   : > { %5317 = shalt.err (!%p5314_p11)
}
  0x8e   : > { %s5405_s30 = smov 64   ;;  %s5406_s13 = smov 4  }
  0x8f   : > { %4607 = dma.hbm_to_vmem [thread:$0]  (!%p5541_p12), %s5848_s11, 2048, %s419_s27, [#allocation10], %s5405_s30, %s5405_s30, %s5406_s13  }
  0x90   : > { %p5878_p13 = scmp.ne.s32.totalorder %s5874_s20, 0 }
  0x91   : > { %p5879_p5 = scmp.eq.s32.totalorder (!%p5878_p13), %s5505_s29, 0 }
  0x92   : > { %446 = sbr.rel (%p5878_p13) target bundleno = 1778 (0x6f2), region = 72 }
  0x99   : > { %5363 = dma.done.wait (%p5879_p5), [#allocation4], 16   ;;  %p5880_p0 = pmov %p5879_p5 }
  0x9b   : > { %5365 = vsyncadd (%p5880_p0), [#allocation4], 4294967280  ;;  %p5881_p6 = pmov %p5880_p0 }
  0x9c   : > { %p5882_p9 = pmov %p5880_p0 }
  0x9d   : > { %5367 = dma.done.wait (%p5881_p6), [#allocation7], 40960  }
  0x9e   : > { %5369 = vsyncadd (%p5882_p9), [#allocation7], 4294926336  ;;  %p5883_p10 = pmov %p5880_p0 }
  0x9f   : > { %p5884_p12 = pmov %p5880_p0 }
  0xa0   : > { %5371 = dma.done.wait (%p5883_p10), [#allocation10], 10240  }
  0xa1   : > { %5373 = vsyncadd (%p5884_p12), [#allocation10], 4294957056  ;;  %s4085_s20 = sshll.u32 %s5505_s29, 1  ;;  %v5407_v0 = vmov 1   ;;  %v5408_v1 = vmov 0   ;;  %v4678_v4 = vld [vmem:[%s5840_s3] sm:$0xff]   ;;  %v525_v38 = vlaneseq }
  0xa2   : > { %4675 = vset.pattern.permute.xlu1 %v5407_v0  ;;  %4674 = vset.pattern.permute.xlu0 %v5408_v1  ;;  %p506_p1 = scmp.lt.s32.totalorder %s4085_s20, 3  ;;  %v5409_v5 = vmov 0.0   ;;  %v4679_v6 = vld [vmem:[%s5840_s3 + $0x8] sm:$0xff]   ;;  %v5410_v7 = vmov 2   ;;  %v4680_v8 = vld [vmem:[%s5840_s3 + $0x10] sm:$0xff]   ;;  %v4681_v9 = vld [vmem:[%s5840_s3 + $0x18] sm:$0xff]  }
  0xa3   : > { %1138 = vmatprep.mubr.bf16.mxu1 %v5408_v1  ;;  %4524 = vmatprep.subr.bf16.mxu0 %v5409_v5  ;;  %vm5411_vm0 = vmmov 0   ;;  %v5687_v10 = vld [vmem:[#allocation6] sm:$0xff]  ;;  %v1010_v14 = vld [vmem:[#allocation6 + $0x10] sm:$0xff]  ;;  %v5696_v39 = vshrl.u32 %v525_v38, 7  ;;  %v4087_v61 = vld [vmem:[%s5839_s2] ss:$0 sm:$0xff] }
  0xa4   : > { %s5901_s20 = smov (!%p506_p1, %s4085_s20), 3  ;;  %4525 = vmatpush3.bf16.msra.mxu0 %v4678_v4  ;;  %4532 = vmatprep.mubr.msk.bf16.mxu0 %vm5411_vm0, %v5409_v5  ;;  %v5689_v11 = vld [vmem:[#allocation6 + $0x20] sm:$0xff]  ;;  %v1011_v15 = vld [vmem:[#allocation6 + $0x30] sm:$0xff]  ;;  %vm614_vm1 = vcmask 523264   ;;  %vm5730_vm2 = vcmp.lt.s32.totalorder %v525_v38, 256  ;;  %s503_s16 = sand.u32 1, %s5384_s26  }
  0xa5   : > { %s4086_s23 = sshll.u32 %s5901_s20, 3  ;;  %4526 = vmatprep.subr.bf16.mxu0 %v5409_v5  ;;  %v4094_v12 = vcombine.low %v5687_v10, %v5689_v11  ;;  %v4095_v13 = vcombine.high %v5687_v10, %v5689_v11  ;;  %v4127_v16 = vcombine.high %v1010_v14, %v1011_v15  ;;  %v4126_v17 = vcombine.low %v1010_v14, %v1011_v15  ;;  %v1012_v18 = vld [vmem:[#allocation6 + $0x50] sm:$0xff]  ;;  %v665_v4 = vld [vmem:[#allocation6 + $0x60] sm:$0xff]  ;;  %s5887_s22 = sld [smem:[#allocation22_spill]] }
  0xa6   : > { %s509_s27 = scalar_lea.vmem %s5837_s0, %s4086_s23  ;;  %v1013_v19 = vld [vmem:[#allocation6 + $0x70] sm:$0xff]  ;;  %v5699_v40 = vsub.s32 1, %v5696_v39  ;;  %v5702_v41 = vsub.s32 0, %v5696_v39  ;;  %v5705_v42 = vsub.s32 2, %v5696_v39  ;;  %v673_v10 = vld [vmem:[#allocation6 + $0x160] sm:$0xff]  ;;  %s4494_s28 = sshll.u32 %s5505_s29, 4 }
  0xa7   : > { %v512_v2 = vld [vmem:[%s509_s27] sm:$0xff]  ;;  %v513_v3 = vld [vmem:[%s509_s27 + $0x8] sm:$0xff]  ;;  %1106 = vmatprep.subr.bf16.mxu1 %v4127_v16  ;;  %v4129_v20 = vcombine.high %v1012_v18, %v1013_v19  ;;  %v4128_v21 = vcombine.low %v1012_v18, %v1013_v19  ;;  %v668_v16 = vld [vmem:[#allocation6 + $0xc0] sm:$0xff]  ;;  %s504_s14 = scalar_lea.vmem [#allocation12], %s503_s16  ;;  %s5888_s25 = sld [smem:[#allocation25_spill]] }
  0xa8   : > { %532 = vperm.xlu1 %4675, %v512_v2   ;;  %517 = vperm.xlu0 %4674, %v512_v2   ;;  %v1014_v22 = vld [vmem:[#allocation6 + $0x90] sm:$0xff]  ;;  %s3966_s17 = sshll.u32 %s504_s14, 4  ;;  %s3954_s23 = scalar_lea.sflag [#allocation5], %s503_s16  ;;  %s5797_s17 = int_to_ptr.vmem [resolvable:$true] %s3966_s17 }
  0xa9   : > { %4527 = vmatpush3.bf16.msra.mxu0 %v4679_v6  ;;  %1107 = vmatpush1.bf16.msra.mxu1 %v4126_v17  ;;  %v1015_v23 = vld [vmem:[#allocation6 + $0xb0] sm:$0xff]  ;;  %v669_v17 = vld [vmem:[#allocation6 + $0xe0] sm:$0xff]  ;;  %s5318_s21 = scalar_lea.vmem %s5797_s17, 16  ;;  %s5413_s29 = smov [#allocation12]  }
  0xaa   : > { %4528 = vmatprep.subr.bf16.mxu0 %v5409_v5  ;;  %1108 = vmatprep.subr.bf16.mxu1 %v4129_v20  ;;  %v4131_v24 = vcombine.high %v1014_v22, %v1015_v23  ;;  %v4130_v25 = vcombine.low %v1014_v22, %v1015_v23  ;;  %v1016_v26 = vld [vmem:[#allocation6 + $0xd0] sm:$0xff]  ;;  %v4101_v19 = vcombine.high %v668_v16, %v669_v17  ;;  %v670_v20 = vld [vmem:[#allocation6 + $0x100] sm:$0xff]  ;;  %p5319_p2 = scmp.ne.s32.totalorder %s5797_s17, %s5318_s21  ;;  %s5322_s18 = sshll.u32 %s5413_s29, 4  ;;  %s5323_s18 = int_to_ptr.vmem [resolvable:$false] %s5322_s18 }
  0xab   : > { %v1017_v27 = vld [vmem:[#allocation6 + $0xf0] sm:$0xff]  ;;  %v4100_v22 = vcombine.low %v668_v16, %v669_v17  ;;  %v848_v16 = vld [vmem:[#allocation6 + $0x148] sm:$0xff]  ;;  %p5890_p3 = scmp.ne.s32.totalorder %s5887_s22, 0  ;;  %s5324_s27 = scalar_lea.vmem %s5323_s18, 32 }
  0xac   : > { %536 = vperm.xlu1 %4675, %v513_v3   ;;  %522 = vperm.xlu0 %4674, %v513_v3   ;;  %v4133_v28 = vcombine.high %v1016_v26, %v1017_v27  ;;  %v4132_v29 = vcombine.low %v1016_v26, %v1017_v27  ;;  %v1018_v30 = vld [vmem:[#allocation6 + $0x110] sm:$0xff]  ;;  %v674_v26 = vld [vmem:[#allocation6 + $0x180] sm:$0xff]  ;;  %v849_v17 = vld [vmem:[#allocation6 + $0x168] sm:$0xff]  ;;  %p5325_p8 = scmp.lt.s32.totalorder %s5797_s17, %s5323_s18  ;;  %p5326_p11 = scmp.lt.s32.totalorder %s5324_s27, %s5318_s21 }
  0xad   : > { %4529 = vmatpush3.bf16.msra.mxu0 %v4680_v8  ;;  %1109 = vmatpush1.bf16.msra.mxu1 %v4128_v21  ;;  %v1019_v31 = vld [vmem:[#allocation6 + $0x130] sm:$0xff]  ;;  %v671_v21 = vld [vmem:[#allocation6 + $0x120] sm:$0xff]  ;;  %s5889_s5 = smov %s5888_s25  ;;  %s5795_s20 = scalar_lea.hbm %s5888_s25, %s4494_s28 }
  0xae   : > { %4530 = vmatprep.subr.bf16.mxu0 %v5409_v5  ;;  %1110 = vmatprep.subr.bf16.mxu1 %v4131_v24  ;;  %v4135_v32 = vcombine.high %v1018_v30, %v1019_v31  ;;  %v4134_v33 = vcombine.low %v1018_v30, %v1019_v31  ;;  %v1020_v34 = vld [vmem:[#allocation6 + $0x150] sm:$0xff]  ;;  %v4103_v23 = vcombine.high %v670_v20, %v671_v21  ;;  %v672_v24 = vld [vmem:[#allocation6 + $0x140] sm:$0xff]  ;;  %p5320_p4 = pnand %p5319_p2, %p5890_p3  ;;  %p5327_p13 = por %p5326_p11, %p5325_p8 }
  0xaf   : > { %v1021_v35 = vld [vmem:[#allocation6 + $0x170] sm:$0xff]  ;;  %v4102_v11 = vcombine.low %v670_v20, %v671_v21  ;;  %v675_v27 = vld [vmem:[#allocation6 + $0x1a0] sm:$0xff]  ;;  %v850_v20 = vld [vmem:[#allocation6 + $0x188] sm:$0xff] }
  0xb0   : > { %4677 = vset.pattern.permute.xlu1 %v5410_v7  ;;  %4676 = vset.pattern.permute.xlu0 %v5410_v7  ;;  %v4137_v36 = vcombine.high %v1020_v34, %v1021_v35  ;;  %v4136_v37 = vcombine.low %v1020_v34, %v1021_v35  ;;  %v514_v43 = vld [vmem:[%s5838_s1] sm:$0x7]  ;;  %v4106_v31 = vcombine.low %v674_v26, %v675_v27  ;;  %v676_v34 = vld [vmem:[#allocation6 + $0x1c0] sm:$0xff]  ;;  %p5321_p7 = pneg %p5320_p4 }
  0xb1   : > { %552 = vperm.xlu1 %4677, %v513_v3   ;;  %548 = vperm.xlu0 %4676, %v512_v2   ;;  %v542_v46 = vrot.slane %v514_v43, %v5699_v40  ;;  %v528_v47 = vrot.slane %v514_v43, %v5702_v41  ;;  %v558_v50 = vrot.slane %v514_v43, %v5705_v42  ;;  %v664_v3 = vld [vmem:[#allocation6 + $0x40] sm:$0xff]  ;;  %v1023_v30 = vld [vmem:[#allocation6 + $0x1b0] sm:$0xff]  ;;  %v851_v21 = vld [vmem:[#allocation6 + $0x1a8] sm:$0xff] }
  0xb2   : > { %4531 = vmatpush3.bf16.msra.mxu0 %v4681_v9  ;;  %1111 = vmatpush1.bf16.msra.mxu1 %v4130_v25  ;;  %v4097_v8 = vcombine.high %v664_v3, %v665_v4  ;;  %v666_v9 = vld [vmem:[#allocation6 + $0x80] sm:$0xff]  ;;  %v4096_v14 = vcombine.low %v664_v3, %v665_v4  ;;  %v4104_v25 = vcombine.low %v672_v24, %v673_v10  ;;  %v1025_v43 = vld [vmem:[#allocation6 + $0x1f0] sm:$0xff]  ;;  %p5328_p5 = pnand %p5327_p13, %p5321_p7 }
  0xb3   : > { %758 = vmatprep.subr.bf16.mxu0 %v4095_v13  ;;  %1112 = vmatprep.subr.bf16.mxu1 %v4133_v28  ;;  %v667_v13 = vld [vmem:[#allocation6 + $0xa0] sm:$0xff]  ;;  %v4107_v28 = vcombine.high %v674_v26, %v675_v27  ;;  %v1183_v26 = vld [vmem:[#allocation6 + $0x38] sm:$0xff] }
  0xb4   : > { %v4099_v15 = vcombine.high %v666_v9, %v667_v13  ;;  %v4098_v18 = vcombine.low %v666_v9, %v667_v13  ;;  %v677_v35 = vld [vmem:[#allocation6 + $0x1e0] sm:$0xff]  ;;  %v846_v9 = vld [vmem:[#allocation6 + $0x108] sm:$0xff] }
  0xb5   : > { %v847_v13 = vld [vmem:[#allocation6 + $0x128] sm:$0xff] }
  0xb6   : > { %1113 = vmatpush1.bf16.msra.mxu1 %v4132_v29  ;;  %v1022_v29 = vld [vmem:[#allocation6 + $0x190] sm:$0xff] }
  0xb7   : > { %1114 = vmatprep.subr.bf16.mxu1 %v4135_v32  ;;  %v4139_v32 = vcombine.high %v1022_v29, %v1023_v30 }
  0xba   : > { %1115 = vmatpush1.bf16.msra.mxu1 %v4134_v33  ;;  %v4138_v33 = vcombine.low %v1022_v29, %v1023_v30  ;;  %v1184_v29 = vld [vmem:[#allocation6 + $0x58] sm:$0xff] }
  0xbb   : > { %1116 = vmatprep.subr.bf16.mxu1 %v4137_v36  ;;  %v4109_v36 = vcombine.high %v676_v34, %v677_v35  ;;  %v1185_v30 = vld [vmem:[#allocation6 + $0x78] sm:$0xff] }
  0xbe   : > { %1117 = vmatpush1.bf16.msra.mxu1 %v4136_v37  ;;  %v1024_v37 = vld [vmem:[#allocation6 + $0x1d0] sm:$0xff] }
  0xbf   : > { %1118 = vmatprep.subr.bf16.mxu1 %v4139_v32  ;;  %v4145_v32 = vcombine.high %v1184_v29, %v1185_v30 }
  0xc2   : > { %1119 = vmatpush1.bf16.msra.mxu1 %v4138_v33  ;;  %v1186_v33 = vld [vmem:[#allocation6 + $0x98] sm:$0xff] }
 0x127   : > { %v533_v44 = vpop.permute.xlu1 %532  ;;  %v518_v45 = vpop.permute.xlu0 %517 }
 0x128   : > { %v543_v51 = vmul.f32 %v542_v46, %v533_v44  ;;  %v529_v52 = vmul.f32 %v528_v47, %v518_v45  ;;  %v4108_v44 = vcombine.low %v676_v34, %v677_v35  ;;  %v4141_v45 = vcombine.high %v1024_v37, %v1025_v43  ;;  %v1187_v34 = vld [vmem:[#allocation6 + $0xb8] sm:$0xff] }
 0x129   : > { %v4144_v35 = vcombine.low %v1184_v29, %v1185_v30  ;;  %v4724_v29 = vld [vmem:[#allocation8 + $0xe0] ss:$16 sps:$4 sm:$0xff]   ;;  %v4727_v30 = vld [vmem:[#allocation8 + $0xe8] ss:$16 sps:$4 sm:$0xff]  }
 0x12a   : > { %v545_v57 = vadd.f32 %v543_v51, %v529_v52  ;;  %1120 = vmatprep.subr.bf16.mxu1 %v4141_v45  ;;  %v4088_v51 = vld [vmem:[#allocation3] ss:$0 sm:$0xff] }
 0x12b   : > { %v537_v48 = vpop.permute.xlu1 %536  ;;  %v523_v49 = vpop.permute.xlu0 %522 }
 0x12c   : > { %v544_v53 = vmul.f32 %v542_v46, %v537_v48  ;;  %v530_v54 = vmul.f32 %v528_v47, %v523_v49  ;;  %v4140_v46 = vcombine.low %v1024_v37, %v1025_v43  ;;  %v838_v47 = vld [vmem:[#allocation6 + $0x8] sm:$0xff]  ;;  %v1188_v37 = vld [vmem:[#allocation6 + $0xd8] sm:$0xff] }
 0x12d   : > { %v839_v48 = vld [vmem:[#allocation6 + $0x28] sm:$0xff]  ;;  %v1189_v43 = vld [vmem:[#allocation6 + $0xf8] sm:$0xff] }
 0x12e   : > { %v546_v58 = vadd.f32 %v544_v53, %v530_v54  ;;  %1121 = vmatpush1.bf16.msra.mxu1 %v4140_v46  ;;  %v4111_v49 = vcombine.high %v838_v47, %v839_v48  ;;  %v4149_v45 = vcombine.high %v1188_v37, %v1189_v43  ;;  %v1190_v46 = vld [vmem:[#allocation6 + $0x118] sm:$0xff] }
 0x130   : > { %v553_v55 = vpop.permute.xlu1 %552  ;;  %v549_v56 = vpop.permute.xlu0 %548 }
 0x131   : > { %v560_v59 = vmul.f32 %v558_v50, %v553_v55  ;;  %v559_v60 = vmul.f32 %v558_v50, %v549_v56  ;;  %v4110_v50 = vcombine.low %v838_v47, %v839_v48  ;;  %v1191_v47 = vld [vmem:[#allocation6 + $0x138] sm:$0xff]  ;;  %v4148_v48 = vcombine.low %v1188_v37, %v1189_v43  ;;  %v4736_v37 = vld [vmem:[#allocation8 + $0x120] ss:$16 sps:$4 sm:$0xff]  }
 0x132   : > { %v4739_v43 = vld [vmem:[#allocation8 + $0x128] ss:$16 sps:$4 sm:$0xff]  }
 0x133   : > { %v562_v62 = vadd.f32 %v560_v59, %v546_v58  ;;  %v561_v63 = vadd.f32 %v559_v60, %v545_v57  ;;  %v840_v58 = vld [vmem:[#allocation6 + $0x48] sm:$0xff] }
 0x134   : > { %v841_v59 = vld [vmem:[#allocation6 + $0x68] sm:$0xff] }
 0x135   : > { %v571_v0 = vadd.f32 %v4087_v61, %v562_v62  ;;  %v570_v2 = vadd.f32 %v4087_v61, %v561_v63  ;;  %v4113_v63 = vcombine.high %v840_v58, %v841_v59  ;;  %v4112_v3 = vcombine.low %v840_v58, %v841_v59  ;;  %v1197_v58 = vld [vmem:[#allocation6 + $0x1f8] sm:$0xff] }
 0x137   : > { %v573_v5 = vmax.f32 %v571_v0, 0.0  ;;  %v572_v6 = vmax.f32 %v570_v2, 0.0  ;;  %v842_v0 = vld [vmem:[#allocation6 + $0x88] sm:$0xff] }
 0x138   : > { %v843_v2 = vld [vmem:[#allocation6 + $0xa8] sm:$0xff] }
 0x139   : > { %v574_v7 = vpack.c.bf16 %v573_v5, %v572_v6  ;;  %v4115_v4 = vcombine.high %v842_v0, %v843_v2  ;;  %v844_v5 = vld [vmem:[#allocation6 + $0xc8] sm:$0xff] }
 0x13a   : > { %v845_v6 = vld [vmem:[#allocation6 + $0xe8] sm:$0xff] }
 0x13b   : > { %4533 = vmatmul.mubr.msk.bf16.vlgmr.msra.gmra.mrb[0].mxu0 %vm614_vm1, %v574_v7  ;;  %v4114_v7 = vcombine.low %v842_v0, %v843_v2  ;;  %v4687_v0 = vld [vmem:[#allocation8 + $0xc] ss:$16 sps:$4 sm:$0xff]   ;;  %v4682_v2 = vld [vmem:[#allocation8] ss:$16 sps:$4 sm:$0xff]  }
 0x13c   : > { %759 = vmatpush1.bf16.msra.mxu0 %v4094_v12  ;;  %790 = vmatprep.mubr.bf16.mxu0 %v5408_v1  ;;  %v4105_v12 = vcombine.high %v672_v24, %v673_v10  ;;  %v852_v24 = vld [vmem:[#allocation6 + $0x1c8] sm:$0xff] }
 0x13d   : > { %760 = vmatprep.subr.bf16.mxu0 %v4097_v8  ;;  %v4117_v8 = vcombine.high %v844_v5, %v845_v6  ;;  %v853_v10 = vld [vmem:[#allocation6 + $0x1e8] sm:$0xff] }
 0x13e   : > { %v4124_v27 = vcombine.low %v852_v24, %v853_v10 }
 0x140   : > { %761 = vmatpush1.bf16.msra.mxu0 %v4096_v14  ;;  %v4116_v14 = vcombine.low %v844_v5, %v845_v6  ;;  %v4693_v5 = vld [vmem:[#allocation8 + $0x2c] ss:$16 sps:$4 sm:$0xff]   ;;  %v4688_v6 = vld [vmem:[#allocation8 + $0x20] ss:$16 sps:$4 sm:$0xff]  }
 0x141   : > { %762 = vmatprep.subr.bf16.mxu0 %v4099_v15  ;;  %v4119_v15 = vcombine.high %v846_v9, %v847_v13 }
 0x144   : > { %763 = vmatpush1.bf16.msra.mxu0 %v4098_v18  ;;  %v4118_v18 = vcombine.low %v846_v9, %v847_v13  ;;  %v4699_v9 = vld [vmem:[#allocation8 + $0x4c] ss:$16 sps:$4 sm:$0xff]   ;;  %v4694_v13 = vld [vmem:[#allocation8 + $0x40] ss:$16 sps:$4 sm:$0xff]  }
 0x145   : > { %764 = vmatprep.subr.bf16.mxu0 %v4101_v19  ;;  %v4121_v19 = vcombine.high %v848_v16, %v849_v17 }
 0x148   : > { %765 = vmatpush1.bf16.msra.mxu0 %v4100_v22  ;;  %v4120_v22 = vcombine.low %v848_v16, %v849_v17  ;;  %v4700_v16 = vld [vmem:[#allocation8 + $0x60] ss:$16 sps:$4 sm:$0xff]   ;;  %v4703_v17 = vld [vmem:[#allocation8 + $0x68] ss:$16 sps:$4 sm:$0xff]  }
 0x149   : > { %766 = vmatprep.subr.bf16.mxu0 %v4103_v23  ;;  %v4123_v23 = vcombine.high %v850_v20, %v851_v21 }
 0x14c   : > { %767 = vmatpush1.bf16.msra.mxu0 %v4102_v11  ;;  %v4122_v11 = vcombine.low %v850_v20, %v851_v21  ;;  %v4706_v20 = vld [vmem:[#allocation8 + $0x80] ss:$16 sps:$4 sm:$0xff]   ;;  %v4709_v21 = vld [vmem:[#allocation8 + $0x88] ss:$16 sps:$4 sm:$0xff]  }
 0x14d   : > { %768 = vmatprep.subr.bf16.mxu0 %v4105_v12  ;;  %v4125_v12 = vcombine.high %v852_v24, %v853_v10  ;;  %v4715_v24 = vld [vmem:[#allocation8 + $0xa8] ss:$16 sps:$4 sm:$0xff]   ;;  %v4717_v10 = vld [vmem:[#allocation8 + $0xac] ss:$16 sps:$4 sm:$0xff]  }
 0x150   : > { %769 = vmatpush1.bf16.msra.mxu0 %v4104_v25  ;;  %v1182_v25 = vld [vmem:[#allocation6 + $0x18] sm:$0xff] }
 0x151   : > { %770 = vmatprep.subr.bf16.mxu0 %v4107_v28  ;;  %v4143_v28 = vcombine.high %v1182_v25, %v1183_v26 }
 0x154   : > { %771 = vmatpush1.bf16.msra.mxu0 %v4106_v31  ;;  %v4142_v31 = vcombine.low %v1182_v25, %v1183_v26  ;;  %v4718_v25 = vld [vmem:[#allocation8 + $0xc0] ss:$16 sps:$4 sm:$0xff]   ;;  %v4721_v26 = vld [vmem:[#allocation8 + $0xc8] ss:$16 sps:$4 sm:$0xff]  }
 0x155   : > { %772 = vmatprep.subr.bf16.mxu0 %v4109_v36  ;;  %v4147_v36 = vcombine.high %v1186_v33, %v1187_v34 }
 0x158   : > { %773 = vmatpush1.bf16.msra.mxu0 %v4108_v44  ;;  %v4146_v44 = vcombine.low %v1186_v33, %v1187_v34  ;;  %v4730_v33 = vld [vmem:[#allocation8 + $0x100] ss:$16 sps:$4 sm:$0xff]   ;;  %v4733_v34 = vld [vmem:[#allocation8 + $0x108] ss:$16 sps:$4 sm:$0xff]  }
 0x159   : > { %934 = vmatprep.subr.bf16.mxu0 %v4111_v49  ;;  %v4151_v49 = vcombine.high %v1190_v46, %v1191_v47 }
 0x20e   : > { %v652_v52 = vpop.f32.mrb[0].mxu0 }
 0x20f   : > { %v653_v53 = vadd.f32 %v4088_v51, %v652_v52  ;;  %v4534_v54 = vpop.f32.mrb[1].mxu0  ;;  %v4150_v52 = vcombine.low %v1190_v46, %v1191_v47  ;;  %v4742_v46 = vld [vmem:[#allocation8 + $0x140] ss:$16 sps:$4 sm:$0xff]   ;;  %v4745_v47 = vld [vmem:[#allocation8 + $0x148] ss:$16 sps:$4 sm:$0xff]  }
 0x210   : > { %v655_v55 = vpop.f32.mrb[2].mxu0  ;;  %v1195_v54 = vld [vmem:[#allocation6 + $0x1b8] sm:$0xff] }
 0x211   : > { %v656_v56 = vadd.f32 %v4088_v51, %v655_v55  ;;  %v4535_v57 = vpop.f32.mrb[3].mxu0  ;;  %v659_v60 = vmax.f32 %v653_v53, 0.0  ;;  %v1193_v51 = vld [vmem:[#allocation6 + $0x178] sm:$0xff] }
 0x212   : > { %v1194_v53 = vld [vmem:[#allocation6 + $0x198] sm:$0xff] }
 0x213   : > { %v660_v61 = vmax.f32 %v656_v56, 0.0  ;;  %v4155_v56 = vcombine.high %v1194_v53, %v1195_v54  ;;  %v1196_v57 = vld [vmem:[#allocation6 + $0x1d8] sm:$0xff]  ;;  %v4154_v59 = vcombine.low %v1194_v53, %v1195_v54  ;;  %v4754_v53 = vld [vmem:[#allocation8 + $0x180] ss:$16 sps:$4 sm:$0xff]  }
 0x214   : > { %v4757_v54 = vld [vmem:[#allocation8 + $0x188] ss:$16 sps:$4 sm:$0xff]  }
 0x215   : > { %v5720_v62 = vpack.c.bf16 %v660_v61, %v659_v60  ;;  %v4157_v60 = vcombine.high %v1196_v57, %v1197_v58  ;;  %v4156_v61 = vcombine.low %v1196_v57, %v1197_v58  ;;  %v4763_v57 = vld [vmem:[#allocation8 + $0x1a8] ss:$16 sps:$4 sm:$0xff]   ;;  %v4765_v58 = vld [vmem:[#allocation8 + $0x1ac] ss:$16 sps:$4 sm:$0xff]  }
 0x217   : > { %791 = vmatmul.mubr.bf16.vlgmr.msra.gmra.mrb[4].mxu0 %v5720_v62  ;;  %1139 = vmatmul.mubr.bf16.vlgmr.msra.gmra.mrb[0].mxu1 %v5720_v62 }
 0x218   : > { %935 = vmatpush1.bf16.msra.mxu0 %v4110_v50  ;;  %966 = vmatprep.mubr.bf16.mxu0 %v5408_v1  ;;  %v1192_v50 = vld [vmem:[#allocation6 + $0x158] sm:$0xff] }
 0x219   : > { %936 = vmatprep.subr.bf16.mxu0 %v4113_v63  ;;  %v4152_v55 = vcombine.low %v1192_v50, %v1193_v51  ;;  %v4684_v63 = vld [vmem:[#allocation8 + $0x4] ss:$16 sps:$4 sm:$0xff]  }
 0x21a   : > { %2965 = vmatprep.subr.bf16.mxu1 %v4684_v63  ;;  %v4769_v63 = vld [vmem:[#allocation8 + $0x1c8] ss:$16 sps:$4 sm:$0xff]  }
 0x21b   : > { %2966 = vmatpush1.bf16.msra.mxu1 %v4682_v2  ;;  %v4777_v2 = vld [vmem:[#allocation8 + $0x1ec] ss:$16 sps:$4 sm:$0xff]  }
 0x21c   : > { %937 = vmatpush1.bf16.msra.mxu0 %v4112_v3  ;;  %v4685_v3 = vld [vmem:[#allocation8 + $0x8] ss:$16 sps:$4 sm:$0xff]  }
 0x21d   : > { %938 = vmatprep.subr.bf16.mxu0 %v4115_v4  ;;  %v4690_v4 = vld [vmem:[#allocation8 + $0x24] ss:$16 sps:$4 sm:$0xff]  }
 0x21e   : > { %2967 = vmatprep.subr.bf16.mxu1 %v4690_v4  ;;  %v4775_v4 = vld [vmem:[#allocation8 + $0x1e8] ss:$16 sps:$4 sm:$0xff]  }
 0x21f   : > { %2968 = vmatpush1.bf16.msra.mxu1 %v4688_v6  ;;  %v4783_v6 = vld [vmem:[#allocation8 + $0x20c] ss:$16 sps:$4 sm:$0xff]  }
 0x220   : > { %939 = vmatpush1.bf16.msra.mxu0 %v4114_v7  ;;  %v4691_v7 = vld [vmem:[#allocation8 + $0x28] ss:$16 sps:$4 sm:$0xff]  }
 0x221   : > { %940 = vmatprep.subr.bf16.mxu0 %v4117_v8  ;;  %v4696_v8 = vld [vmem:[#allocation8 + $0x44] ss:$16 sps:$4 sm:$0xff]  }
 0x222   : > { %2969 = vmatprep.subr.bf16.mxu1 %v4696_v8 }
 0x223   : > { %2970 = vmatpush1.bf16.msra.mxu1 %v4694_v13 }
 0x224   : > { %941 = vmatpush1.bf16.msra.mxu0 %v4116_v14  ;;  %v4702_v14 = vld [vmem:[#allocation8 + $0x64] ss:$16 sps:$4 sm:$0xff]  }
 0x225   : > { %942 = vmatprep.subr.bf16.mxu0 %v4119_v15  ;;  %v4705_v15 = vld [vmem:[#allocation8 + $0x6c] ss:$16 sps:$4 sm:$0xff]   ;;  %2971 = vmatprep.subr.bf16.mxu1 %v4702_v14 }
 0x227   : > { %2972 = vmatpush1.bf16.msra.mxu1 %v4700_v16 }
 0x228   : > { %943 = vmatpush1.bf16.msra.mxu0 %v4118_v18  ;;  %v4708_v18 = vld [vmem:[#allocation8 + $0x84] ss:$16 sps:$4 sm:$0xff]  }
 0x229   : > { %944 = vmatprep.subr.bf16.mxu0 %v4121_v19  ;;  %v4711_v19 = vld [vmem:[#allocation8 + $0x8c] ss:$16 sps:$4 sm:$0xff]   ;;  %2973 = vmatprep.subr.bf16.mxu1 %v4708_v18 }
 0x22b   : > { %2974 = vmatpush1.bf16.msra.mxu1 %v4706_v20 }
 0x22c   : > { %945 = vmatpush1.bf16.msra.mxu0 %v4120_v22  ;;  %v4714_v22 = vld [vmem:[#allocation8 + $0xa4] ss:$16 sps:$4 sm:$0xff]  }
 0x22d   : > { %946 = vmatprep.subr.bf16.mxu0 %v4123_v23  ;;  %v4712_v23 = vld [vmem:[#allocation8 + $0xa0] ss:$16 sps:$4 sm:$0xff]   ;;  %2975 = vmatprep.subr.bf16.mxu1 %v4714_v22 }
 0x22f   : > { %2976 = vmatpush1.bf16.msra.mxu1 %v4712_v23 }
 0x230   : > { %947 = vmatpush1.bf16.msra.mxu0 %v4122_v11  ;;  %v4720_v11 = vld [vmem:[#allocation8 + $0xc4] ss:$16 sps:$4 sm:$0xff]  }
 0x231   : > { %948 = vmatprep.subr.bf16.mxu0 %v4125_v12  ;;  %v4723_v12 = vld [vmem:[#allocation8 + $0xcc] ss:$16 sps:$4 sm:$0xff]   ;;  %2977 = vmatprep.subr.bf16.mxu1 %v4720_v11 }
 0x233   : > { %2978 = vmatpush1.bf16.msra.mxu1 %v4718_v25  ;;  %v5412_v25 = vmov 1966171168  }
 0x234   : > { %949 = vmatpush1.bf16.msra.mxu0 %v4124_v27  ;;  %v4726_v27 = vld [vmem:[#allocation8 + $0xe4] ss:$16 sps:$4 sm:$0xff]  }
 0x235   : > { %1278 = vmatprep.subr.bf16.mxu0 %v4143_v28  ;;  %v4729_v28 = vld [vmem:[#allocation8 + $0xec] ss:$16 sps:$4 sm:$0xff]   ;;  %2979 = vmatprep.subr.bf16.mxu1 %v4726_v27 }
 0x237   : > { %967 = vmatmul.mubr.bf16.vlgmr.msra.gmra.mrb[8].mxu0 %v5720_v62  ;;  %2980 = vmatpush1.bf16.msra.mxu1 %v4724_v29 }
 0x238   : > { %1279 = vmatpush1.bf16.msra.mxu0 %v4142_v31  ;;  %1310 = vmatprep.mubr.bf16.mxu0 %v5408_v1  ;;  %v4153_v1 = vcombine.high %v1192_v50, %v1193_v51  ;;  %v4732_v31 = vld [vmem:[#allocation8 + $0x104] ss:$16 sps:$4 sm:$0xff]   ;;  %v4748_v50 = vld [vmem:[#allocation8 + $0x160] ss:$16 sps:$4 sm:$0xff]   ;;  %v4751_v51 = vld [vmem:[#allocation8 + $0x168] ss:$16 sps:$4 sm:$0xff]  }
 0x239   : > { %1280 = vmatprep.subr.bf16.mxu0 %v4145_v32  ;;  %v4735_v32 = vld [vmem:[#allocation8 + $0x10c] ss:$16 sps:$4 sm:$0xff]   ;;  %2981 = vmatprep.subr.bf16.mxu1 %v4732_v31 }
 0x23b   : > { %2982 = vmatpush1.bf16.msra.mxu1 %v4730_v33 }
 0x23c   : > { %1281 = vmatpush1.bf16.msra.mxu0 %v4144_v35  ;;  %v4738_v35 = vld [vmem:[#allocation8 + $0x124] ss:$16 sps:$4 sm:$0xff]  }
 0x23d   : > { %1282 = vmatprep.subr.bf16.mxu0 %v4147_v36  ;;  %v4741_v36 = vld [vmem:[#allocation8 + $0x12c] ss:$16 sps:$4 sm:$0xff]   ;;  %2983 = vmatprep.subr.bf16.mxu1 %v4738_v35 }
 0x23f   : > { %2984 = vmatpush1.bf16.msra.mxu1 %v4736_v37 }
 0x240   : > { %1283 = vmatpush1.bf16.msra.mxu0 %v4146_v44  ;;  %v4744_v44 = vld [vmem:[#allocation8 + $0x144] ss:$16 sps:$4 sm:$0xff]  }
 0x241   : > { %1284 = vmatprep.subr.bf16.mxu0 %v4149_v45  ;;  %v4747_v45 = vld [vmem:[#allocation8 + $0x14c] ss:$16 sps:$4 sm:$0xff]   ;;  %2985 = vmatprep.subr.bf16.mxu1 %v4744_v44 }
 0x243   : > { %2986 = vmatpush1.bf16.msra.mxu1 %v4742_v46 }
 0x244   : > { %1285 = vmatpush1.bf16.msra.mxu0 %v4148_v48  ;;  %v4750_v48 = vld [vmem:[#allocation8 + $0x164] ss:$16 sps:$4 sm:$0xff]  }
 0x245   : > { %1286 = vmatprep.subr.bf16.mxu0 %v4151_v49  ;;  %v4753_v49 = vld [vmem:[#allocation8 + $0x16c] ss:$16 sps:$4 sm:$0xff]   ;;  %2987 = vmatprep.subr.bf16.mxu1 %v4750_v48 }
 0x247   : > { %2988 = vmatpush1.bf16.msra.mxu1 %v4748_v50 }
 0x248   : > { %1287 = vmatpush1.bf16.msra.mxu0 %v4150_v52  ;;  %v4756_v52 = vld [vmem:[#allocation8 + $0x184] ss:$16 sps:$4 sm:$0xff]  }
 0x249   : > { %1288 = vmatprep.subr.bf16.mxu0 %v4153_v1  ;;  %v4759_v1 = vld [vmem:[#allocation8 + $0x18c] ss:$16 sps:$4 sm:$0xff]   ;;  %2989 = vmatprep.subr.bf16.mxu1 %v4756_v52 }
 0x24b   : > { %2990 = vmatpush1.bf16.msra.mxu1 %v4754_v53 }
 0x24c   : > { %1289 = vmatpush1.bf16.msra.mxu0 %v4152_v55  ;;  %v4762_v55 = vld [vmem:[#allocation8 + $0x1a4] ss:$16 sps:$4 sm:$0xff]  }
 0x24d   : > { %1290 = vmatprep.subr.bf16.mxu0 %v4155_v56  ;;  %v4760_v56 = vld [vmem:[#allocation8 + $0x1a0] ss:$16 sps:$4 sm:$0xff]   ;;  %2991 = vmatprep.subr.bf16.mxu1 %v4762_v55 }
 0x24f   : > { %2992 = vmatpush1.bf16.msra.mxu1 %v4760_v56 }
 0x250   : > { %1291 = vmatpush1.bf16.msra.mxu0 %v4154_v59  ;;  %v4768_v59 = vld [vmem:[#allocation8 + $0x1c4] ss:$16 sps:$4 sm:$0xff]  }
 0x251   : > { %1292 = vmatprep.subr.bf16.mxu0 %v4157_v60  ;;  %v4771_v60 = vld [vmem:[#allocation8 + $0x1cc] ss:$16 sps:$4 sm:$0xff]   ;;  %2993 = vmatprep.subr.bf16.mxu1 %v4768_v59 }
 0x254   : > { %1293 = vmatpush1.bf16.msra.mxu0 %v4156_v61  ;;  %v4766_v61 = vld [vmem:[#allocation8 + $0x1c0] ss:$16 sps:$4 sm:$0xff]  }
 0x255   : > { %3129 = vmatprep.subr.bf16.mxu0 %v4687_v0  ;;  %v4774_v0 = vld [vmem:[#allocation8 + $0x1e4] ss:$16 sps:$4 sm:$0xff]   ;;  %2994 = vmatpush1.bf16.msra.mxu1 %v4766_v61 }
 0x256   : > { %2995 = vmatprep.subr.bf16.mxu1 %v4774_v0 }
 0x257   : > { %1311 = vmatmul.mubr.bf16.vlgmr.msra.gmra.mrb[12].mxu0 %v5720_v62  ;;  %v4697_v62 = vld [vmem:[#allocation8 + $0x48] ss:$16 sps:$4 sm:$0xff]  }
 0x258   : > { %3130 = vmatpush1.bf16.msra.mxu0 %v4685_v3  ;;  %v4772_v3 = vld [vmem:[#allocation8 + $0x1e0] ss:$16 sps:$4 sm:$0xff]  }
 0x259   : > { %3131 = vmatprep.subr.bf16.mxu0 %v4693_v5  ;;  %2996 = vmatpush1.bf16.msra.mxu1 %v4772_v3  ;;  %v4780_v5 = vld [vmem:[#allocation8 + $0x204] ss:$16 sps:$4 sm:$0xff]  }
 0x25a   : > { %3006 = vmatprep.subr.bf16.mxu1 %v4780_v5 }
 0x25c   : > { %3132 = vmatpush1.bf16.msra.mxu0 %v4691_v7 }
 0x25d   : > { %3133 = vmatprep.subr.bf16.mxu0 %v4699_v9 }
 0x260   : > { %3134 = vmatpush1.bf16.msra.mxu0 %v4697_v62 }
 0x261   : > { %3135 = vmatprep.subr.bf16.mxu0 %v4705_v15 }
 0x264   : > { %3136 = vmatpush1.bf16.msra.mxu0 %v4703_v17 }
 0x265   : > { %3137 = vmatprep.subr.bf16.mxu0 %v4711_v19 }
 0x268   : > { %3138 = vmatpush1.bf16.msra.mxu0 %v4709_v21 }
 0x269   : > { %3139 = vmatprep.subr.bf16.mxu0 %v4717_v10 }
 0x26c   : > { %3140 = vmatpush1.bf16.msra.mxu0 %v4715_v24 }
 0x26d   : > { %3141 = vmatprep.subr.bf16.mxu0 %v4723_v12 }
 0x270   : > { %3142 = vmatpush1.bf16.msra.mxu0 %v4721_v26  ;;  %v819_v26 = vunpack.c.l.s4 %v5412_v25 }
 0x271   : > { %3143 = vmatprep.subr.bf16.mxu0 %v4729_v28 }
 0x272   : > { %v820_v35 = vunpack.c.0.s8 %v819_v26 }
 0x274   : > { %3144 = vmatpush1.bf16.msra.mxu0 %v4727_v30 }
 0x275   : > { %3145 = vmatprep.subr.bf16.mxu0 %v4735_v32 }
 0x278   : > { %3146 = vmatpush1.bf16.msra.mxu0 %v4733_v34 }
 0x279   : > { %3147 = vmatprep.subr.bf16.mxu0 %v4741_v36 }
 0x27c   : > { %3148 = vmatpush1.bf16.msra.mxu0 %v4739_v43 }
 0x27d   : > { %3149 = vmatprep.subr.bf16.mxu0 %v4747_v45 }
 0x280   : > { %3150 = vmatpush1.bf16.msra.mxu0 %v4745_v47 }
 0x281   : > { %3151 = vmatprep.subr.bf16.mxu0 %v4753_v49  ;;  %v823_v49 = vsub.s32 %v820_v35, %v5696_v39  ;;  %v1355_v35 = vld [vmem:[%s5843_s6] sm:$0xff] }
 0x284   : > { %3152 = vmatpush1.bf16.msra.mxu0 %v4751_v51 }
 0x285   : > { %3153 = vmatprep.subr.bf16.mxu0 %v4759_v1 }
 0x288   : > { %3154 = vmatpush1.bf16.msra.mxu0 %v4757_v54  ;;  %v4784_v54 = vld [vmem:[#allocation8 + $0x220] ss:$16 sps:$4 sm:$0xff]  }
 0x289   : > { %3155 = vmatprep.subr.bf16.mxu0 %v4765_v58 }
 0x28c   : > { %3156 = vmatpush1.bf16.msra.mxu0 %v4763_v57 }
 0x28d   : > { %3157 = vmatprep.subr.bf16.mxu0 %v4771_v60 }
 0x290   : > { %3158 = vmatpush1.bf16.msra.mxu0 %v4769_v63 }
 0x291   : > { %3159 = vmatprep.subr.bf16.mxu0 %v4777_v2 }
 0x294   : > { %3160 = vmatpush1.bf16.msra.mxu0 %v4775_v4 }
 0x295   : > { %3170 = vmatprep.subr.bf16.mxu0 %v4783_v6 }
 0x2ea   : > { %v792_v7 = vpop.f32.mrb[4].mxu0  ;;  %v1140_v8 = vpop.f32.mrb[0].mxu1 }
 0x2eb   : > { %v794_v9 = vpop.f32.mrb[5].mxu0  ;;  %v1142_v13 = vpop.f32.mrb[1].mxu1 }
 0x2ec   : > { %v796_v62 = vpop.f32.mrb[6].mxu0  ;;  %v1144_v14 = vpop.f32.mrb[2].mxu1 }
 0x2ed   : > { %v801_v15 = vmax.f32 %v792_v7, %v796_v62  ;;  %v1149_v16 = vmax.f32 %v1140_v8, %v1144_v14  ;;  %v798_v17 = vpop.f32.mrb[7].mxu0  ;;  %v1146_v18 = vpop.f32.mrb[3].mxu1 }
 0x2ee   : > { %v808_v19 = vmax.f32 %v794_v9, %v798_v17  ;;  %v1156_v20 = vmax.f32 %v1142_v13, %v1146_v18 }
 0x2ef   : > { %v802_v21 = vrot.slane %v801_v15, 4  ;;  %v1150_v22 = vrot.slane %v1149_v16, 4 }
 0x2f0   : > { %v809_v23 = vrot.slane %v808_v19, 4  ;;  %v1157_v24 = vrot.slane %v1156_v20, 4 }
 0x2f1   : > { %v803_v10 = vmax.f32 %v801_v15, %v802_v21  ;;  %v1151_v11 = vmax.f32 %v1149_v16, %v1150_v22 }
 0x2f2   : > { %v810_v12 = vmax.f32 %v808_v19, %v809_v23  ;;  %v1158_v27 = vmax.f32 %v1156_v20, %v1157_v24 }
 0x2f3   : > { %v804_v28 = vrot.slane %v803_v10, 2  ;;  %v1152_v29 = vrot.slane %v1151_v11, 2 }
 0x2f4   : > { %v811_v30 = vrot.slane %v810_v12, 2  ;;  %v1159_v31 = vrot.slane %v1158_v27, 2 }
 0x2f5   : > { %v805_v32 = vmax.f32 %v803_v10, %v804_v28  ;;  %v1153_v33 = vmax.f32 %v1151_v11, %v1152_v29 }
 0x2f6   : > { %v812_v34 = vmax.f32 %v810_v12, %v811_v30  ;;  %v1160_v36 = vmax.f32 %v1158_v27, %v1159_v31 }
 0x2f7   : > { %v806_v37 = vrot.slane %v805_v32, 1  ;;  %v1154_v43 = vrot.slane %v1153_v33, 1 }
 0x2f8   : > { %v813_v44 = vrot.slane %v812_v34, 1  ;;  %v1161_v45 = vrot.slane %v1160_v36, 1 }
 0x2f9   : > { %v807_v46 = vmax.f32 %v805_v32, %v806_v37  ;;  %v1155_v47 = vmax.f32 %v1153_v33, %v1154_v43  ;;  %v1373_v43 = vsub.s32 3, %v5696_v39 }
 0x2fa   : > { %v814_v48 = vmax.f32 %v812_v34, %v813_v44  ;;  %v1162_v50 = vmax.f32 %v1160_v36, %v1161_v45 }
 0x2fc   : > { %v817_v51 = vcombine.low %v807_v46, %v814_v48  ;;  %v1165_v52 = vcombine.low %v1155_v47, %v1162_v50  ;;  %v4781_v50 = vld [vmem:[#allocation8 + $0x208] ss:$16 sps:$4 sm:$0xff]  }
 0x2fe   : > { %v824_v1 = vrot.slane %v817_v51, %v823_v49  ;;  %v1172_v53 = vrot.slane %v1165_v52, %v823_v49  ;;  %v4786_v52 = vld [vmem:[#allocation8 + $0x224] ss:$16 sps:$4 sm:$0xff]  }
 0x300   : > { %v831_v55 = vrot.slane %v824_v1, %v823_v49  ;;  %v1179_v56 = vrot.slane %v1172_v53, %v823_v49  ;;  %v4789_v1 = vld [vmem:[#allocation8 + $0x22c] ss:$16 sps:$4 sm:$0xff]  }
 0x302   : > { %837 = vst.msk [vmem:[#allocation2] sm:$0x3] %vm5730_vm2, %v831_v55  ;;  %1181 = vst.msk [vmem:[#allocation2 + $0x4] sm:$0x3] %vm5730_vm2, %v1179_v56  ;;  %v4787_v55 = vld [vmem:[#allocation8 + $0x228] ss:$16 sps:$4 sm:$0xff]  }
 0x303   : > { %v4792_v56 = vld [vmem:[#allocation8 + $0x244] ss:$16 sps:$4 sm:$0xff]  }
 0x30a   : > { %v968_v57 = vpop.f32.mrb[8].mxu0 }
 0x30b   : > { %v970_v58 = vpop.f32.mrb[9].mxu0 }
 0x30c   : > { %v972_v59 = vpop.f32.mrb[10].mxu0 }
 0x30d   : > { %v977_v60 = vmax.f32 %v968_v57, %v972_v59  ;;  %v974_v61 = vpop.f32.mrb[11].mxu0  ;;  %v4795_v57 = vld [vmem:[#allocation8 + $0x24c] ss:$16 sps:$4 sm:$0xff]   ;;  %v4793_v59 = vld [vmem:[#allocation8 + $0x248] ss:$16 sps:$4 sm:$0xff]  }
 0x30e   : > { %v984_v63 = vmax.f32 %v970_v58, %v974_v61  ;;  %v4790_v58 = vld [vmem:[#allocation8 + $0x240] ss:$16 sps:$4 sm:$0xff]   ;;  %v4801_v61 = vld [vmem:[#allocation8 + $0x26c] ss:$16 sps:$4 sm:$0xff]  }
 0x30f   : > { %v978_v0 = vrot.slane %v977_v60, 4 }
 0x310   : > { %v985_v2 = vrot.slane %v984_v63, 4 }
 0x311   : > { %v979_v38 = vmax.f32 %v977_v60, %v978_v0  ;;  %v4798_v60 = vld [vmem:[#allocation8 + $0x264] ss:$16 sps:$4 sm:$0xff]   ;;  %v4799_v0 = vld [vmem:[#allocation8 + $0x268] ss:$16 sps:$4 sm:$0xff]  }
 0x312   : > { %v986_v3 = vmax.f32 %v984_v63, %v985_v2  ;;  %v4796_v63 = vld [vmem:[#allocation8 + $0x260] ss:$16 sps:$4 sm:$0xff]   ;;  %v4804_v2 = vld [vmem:[#allocation8 + $0x284] ss:$16 sps:$4 sm:$0xff]  }
 0x313   : > { %v980_v4 = vrot.slane %v979_v38, 2 }
 0x314   : > { %v987_v5 = vrot.slane %v986_v3, 2 }
 0x315   : > { %v981_v6 = vmax.f32 %v979_v38, %v980_v4  ;;  %v4807_v38 = vld [vmem:[#allocation8 + $0x28c] ss:$16 sps:$4 sm:$0xff]   ;;  %v4805_v4 = vld [vmem:[#allocation8 + $0x288] ss:$16 sps:$4 sm:$0xff]  }
 0x316   : > { %v988_v7 = vmax.f32 %v986_v3, %v987_v5  ;;  %v4802_v3 = vld [vmem:[#allocation8 + $0x280] ss:$16 sps:$4 sm:$0xff]   ;;  %v4810_v5 = vld [vmem:[#allocation8 + $0x2a4] ss:$16 sps:$4 sm:$0xff]  }
 0x317   : > { %v982_v8 = vrot.slane %v981_v6, 1 }
 0x318   : > { %v989_v9 = vrot.slane %v988_v7, 1 }
 0x319   : > { %v983_v13 = vmax.f32 %v981_v6, %v982_v8  ;;  %v4813_v6 = vld [vmem:[#allocation8 + $0x2ac] ss:$16 sps:$4 sm:$0xff]   ;;  %v4811_v8 = vld [vmem:[#allocation8 + $0x2a8] ss:$16 sps:$4 sm:$0xff]  }
 0x31a   : > { %v990_v62 = vmax.f32 %v988_v7, %v989_v9  ;;  %v4808_v7 = vld [vmem:[#allocation8 + $0x2a0] ss:$16 sps:$4 sm:$0xff]   ;;  %v4816_v9 = vld [vmem:[#allocation8 + $0x2c4] ss:$16 sps:$4 sm:$0xff]  }
 0x31c   : > { %v993_v14 = vcombine.low %v983_v13, %v990_v62  ;;  %v4819_v13 = vld [vmem:[#allocation8 + $0x2cc] ss:$16 sps:$4 sm:$0xff]   ;;  %v4814_v62 = vld [vmem:[#allocation8 + $0x2c0] ss:$16 sps:$4 sm:$0xff]  }
 0x31e   : > { %v1000_v15 = vrot.slane %v993_v14, %v823_v49  ;;  %v4817_v14 = vld [vmem:[#allocation8 + $0x2c8] ss:$16 sps:$4 sm:$0xff]  }
 0x320   : > { %v1007_v16 = vrot.slane %v1000_v15, %v823_v49  ;;  %v4822_v15 = vld [vmem:[#allocation8 + $0x2e4] ss:$16 sps:$4 sm:$0xff]  }
 0x322   : > { %1009 = vst.msk [vmem:[#allocation2 + $0x2] sm:$0x3] %vm5730_vm2, %v1007_v16  ;;  %v4825_v16 = vld [vmem:[#allocation8 + $0x2ec] ss:$16 sps:$4 sm:$0xff]  }
 0x32a   : > { %v1312_v17 = vpop.f32.mrb[12].mxu0 }
 0x32b   : > { %v1314_v18 = vpop.f32.mrb[13].mxu0 }
 0x32c   : > { %v1316_v19 = vpop.f32.mrb[14].mxu0 }
 0x32d   : > { %v1321_v20 = vmax.f32 %v1312_v17, %v1316_v19  ;;  %v1318_v21 = vpop.f32.mrb[15].mxu0  ;;  %v4820_v17 = vld [vmem:[#allocation8 + $0x2e0] ss:$16 sps:$4 sm:$0xff]   ;;  %v4828_v19 = vld [vmem:[#allocation8 + $0x304] ss:$16 sps:$4 sm:$0xff]  }
 0x32e   : > { %v1328_v22 = vmax.f32 %v1314_v18, %v1318_v21  ;;  %v4823_v18 = vld [vmem:[#allocation8 + $0x2e8] ss:$16 sps:$4 sm:$0xff]   ;;  %v4826_v21 = vld [vmem:[#allocation8 + $0x300] ss:$16 sps:$4 sm:$0xff]  }
 0x32f   : > { %v1322_v23 = vrot.slane %v1321_v20, 4 }
 0x330   : > { %v1329_v24 = vrot.slane %v1328_v22, 4 }
 0x331   : > { %v1323_v10 = vmax.f32 %v1321_v20, %v1322_v23  ;;  %v4831_v20 = vld [vmem:[#allocation8 + $0x30c] ss:$16 sps:$4 sm:$0xff]   ;;  %v4834_v23 = vld [vmem:[#allocation8 + $0x324] ss:$16 sps:$4 sm:$0xff]  }
 0x332   : > { %v1330_v11 = vmax.f32 %v1328_v22, %v1329_v24  ;;  %v4829_v22 = vld [vmem:[#allocation8 + $0x308] ss:$16 sps:$4 sm:$0xff]   ;;  %v4837_v24 = vld [vmem:[#allocation8 + $0x32c] ss:$16 sps:$4 sm:$0xff]  }
 0x333   : > { %v1324_v12 = vrot.slane %v1323_v10, 2 }
 0x334   : > { %v1331_v25 = vrot.slane %v1330_v11, 2 }
 0x335   : > { %v1325_v26 = vmax.f32 %v1323_v10, %v1324_v12  ;;  %v4832_v10 = vld [vmem:[#allocation8 + $0x320] ss:$16 sps:$4 sm:$0xff]   ;;  %v4840_v12 = vld [vmem:[#allocation8 + $0x344] ss:$16 sps:$4 sm:$0xff]  }
 0x336   : > { %v1332_v27 = vmax.f32 %v1330_v11, %v1331_v25  ;;  %v4835_v11 = vld [vmem:[#allocation8 + $0x328] ss:$16 sps:$4 sm:$0xff]   ;;  %v4843_v25 = vld [vmem:[#allocation8 + $0x34c] ss:$16 sps:$4 sm:$0xff]  }
 0x337   : > { %v1326_v28 = vrot.slane %v1325_v26, 1 }
 0x338   : > { %v1333_v29 = vrot.slane %v1332_v27, 1 }
 0x339   : > { %v1327_v30 = vmax.f32 %v1325_v26, %v1326_v28  ;;  %v4838_v26 = vld [vmem:[#allocation8 + $0x340] ss:$16 sps:$4 sm:$0xff]   ;;  %v4846_v28 = vld [vmem:[#allocation8 + $0x364] ss:$16 sps:$4 sm:$0xff]  }
 0x33a   : > { %v1334_v31 = vmax.f32 %v1332_v27, %v1333_v29  ;;  %v4841_v27 = vld [vmem:[#allocation8 + $0x348] ss:$16 sps:$4 sm:$0xff]   ;;  %v4849_v29 = vld [vmem:[#allocation8 + $0x36c] ss:$16 sps:$4 sm:$0xff]  }
 0x33c   : > { %v1337_v32 = vcombine.low %v1327_v30, %v1334_v31  ;;  %v4844_v30 = vld [vmem:[#allocation8 + $0x360] ss:$16 sps:$4 sm:$0xff]   ;;  %v4847_v31 = vld [vmem:[#allocation8 + $0x368] ss:$16 sps:$4 sm:$0xff]  }
 0x33e   : > { %v1344_v33 = vrot.slane %v1337_v32, %v823_v49  ;;  %v4852_v32 = vld [vmem:[#allocation8 + $0x384] ss:$16 sps:$4 sm:$0xff]  }
 0x340   : > { %v1351_v34 = vrot.slane %v1344_v33, %v823_v49  ;;  %v4778_v49 = vld [vmem:[#allocation8 + $0x200] ss:$16 sps:$4 sm:$0xff]   ;;  %v4855_v33 = vld [vmem:[#allocation8 + $0x38c] ss:$16 sps:$4 sm:$0xff]  }
 0x342   : > { %1353 = vst.msk [vmem:[#allocation2 + $0x6] sm:$0x3] %vm5730_vm2, %v1351_v34  ;;  %v4850_v34 = vld [vmem:[#allocation8 + $0x380] ss:$16 sps:$4 sm:$0xff]  }
 0x349   : > { %v1354_v36 = vld [vmem:[#allocation2] sm:$0xff] }
 0x34a   : > { %v1356_v37 = vadd.f32 %v1355_v35, %v1354_v36  ;;  %v4853_v35 = vld [vmem:[#allocation8 + $0x388] ss:$16 sps:$4 sm:$0xff]   ;;  %v4858_v36 = vld [vmem:[#allocation8 + $0x3a4] ss:$16 sps:$4 sm:$0xff]  }
 0x34c   : > { %v5746_v44 = vmax.f32 %v1356_v37, 0.0  ;;  %v4861_v37 = vld [vmem:[#allocation8 + $0x3ac] ss:$16 sps:$4 sm:$0xff]  }
 0x34e   : > { %v1366_v45 = vrot.slane %v5746_v44, %v5699_v40  ;;  %v1362_v46 = vrot.slane %v5746_v44, %v5702_v41  ;;  %v1374_v47 = vrot.slane %v5746_v44, %v1373_v43 }
 0x350   : > { %v1400_v48 = vpack.c.bf16 %v1366_v45, %v1366_v45  ;;  %v1399_v51 = vpack.c.bf16 %v1362_v46, %v1362_v46  ;;  %v1402_v53 = vpack.c.bf16 %v1374_v47, %v1374_v47  ;;  %v4856_v45 = vld [vmem:[#allocation8 + $0x3a0] ss:$16 sps:$4 sm:$0xff]   ;;  %v4859_v46 = vld [vmem:[#allocation8 + $0x3a8] ss:$16 sps:$4 sm:$0xff]   ;;  %v4864_v47 = vld [vmem:[#allocation8 + $0x3c4] ss:$16 sps:$4 sm:$0xff]  }
 0x352   : > { %2997 = vmatprep.mubr.bf16.mxu1 %v1400_v48  ;;  %3161 = vmatprep.mubr.bf16.mxu0 %v1400_v48  ;;  %v4867_v48 = vld [vmem:[#allocation8 + $0x3cc] ss:$16 sps:$4 sm:$0xff]  }
 0x353   : > { %2998 = vmatmul.mubr.bf16.vlgmr.msra.gmra.mrb[4].mxu1 %v1399_v51  ;;  %3162 = vmatmul.mubr.bf16.vlgmr.msra.gmra.mrb[16].mxu0 %v1399_v51  ;;  %v4870_v51 = vld [vmem:[#allocation8 + $0x3e4] ss:$16 sps:$4 sm:$0xff]  }
 0x354   : > { %3007 = vmatpush1.bf16.msra.mxu1 %v4778_v49  ;;  %3171 = vmatpush1.bf16.msra.mxu0 %v4781_v50  ;;  %v4862_v49 = vld [vmem:[#allocation8 + $0x3c0] ss:$16 sps:$4 sm:$0xff]   ;;  %v4865_v50 = vld [vmem:[#allocation8 + $0x3c8] ss:$16 sps:$4 sm:$0xff]  }
 0x355   : > { %3038 = vmatprep.mubr.bf16.mxu1 %v1402_v53  ;;  %3202 = vmatprep.mubr.bf16.mxu0 %v1402_v53  ;;  %v4868_v53 = vld [vmem:[#allocation8 + $0x3e0] ss:$16 sps:$4 sm:$0xff]  }
 0x356   : > { %3008 = vmatprep.subr.bf16.mxu1 %v4786_v52  ;;  %3172 = vmatprep.subr.bf16.mxu0 %v4789_v1  ;;  %v4873_v52 = vld [vmem:[#allocation8 + $0x3ec] ss:$16 sps:$4 sm:$0xff]   ;;  %v1381_v1 = vsub.s32 5, %v5696_v39 }
 0x358   : > { %3009 = vmatpush1.bf16.msra.mxu1 %v4784_v54  ;;  %3173 = vmatpush1.bf16.msra.mxu0 %v4787_v55  ;;  %v4871_v54 = vld [vmem:[#allocation8 + $0x3e8] ss:$16 sps:$4 sm:$0xff]   ;;  %v1370_v55 = vrot.slane %v5746_v44, %v5705_v42 }
 0x359   : > { %3010 = vmatprep.subr.bf16.mxu1 %v4792_v56  ;;  %3174 = vmatprep.subr.bf16.mxu0 %v4795_v57  ;;  %v4876_v56 = vld [vmem:[#allocation8 + $0x404] ss:$16 sps:$4 sm:$0xff]   ;;  %v4879_v57 = vld [vmem:[#allocation8 + $0x40c] ss:$16 sps:$4 sm:$0xff]  }
 0x35c   : > { %3011 = vmatpush1.bf16.msra.mxu1 %v4790_v58  ;;  %3175 = vmatpush1.bf16.msra.mxu0 %v4793_v59  ;;  %v1382_v58 = vrot.slane %v5746_v44, %v1381_v1  ;;  %v4874_v59 = vld [vmem:[#allocation8 + $0x400] ss:$16 sps:$4 sm:$0xff]   ;;  %v4949_v1 = vld [vmem:[#allocation8 + $0x588] ss:$16 sps:$4 sm:$0xff]  }
 0x35d   : > { %3012 = vmatprep.subr.bf16.mxu1 %v4798_v60  ;;  %3176 = vmatprep.subr.bf16.mxu0 %v4801_v61  ;;  %v1401_v60 = vpack.c.bf16 %v1370_v55, %v1370_v55  ;;  %v4877_v61 = vld [vmem:[#allocation8 + $0x408] ss:$16 sps:$4 sm:$0xff]   ;;  %v4952_v55 = vld [vmem:[#allocation8 + $0x5a0] ss:$16 sps:$4 sm:$0xff]  }
 0x360   : > { %3013 = vmatpush1.bf16.msra.mxu1 %v4796_v63  ;;  %3177 = vmatpush1.bf16.msra.mxu0 %v4799_v0  ;;  %v1404_v63 = vpack.c.bf16 %v1382_v58, %v1382_v58  ;;  %v4882_v0 = vld [vmem:[#allocation8 + $0x424] ss:$16 sps:$4 sm:$0xff]   ;;  %v4963_v58 = vld [vmem:[#allocation8 + $0x5cc] ss:$16 sps:$4 sm:$0xff]  }
 0x361   : > { %3014 = vmatprep.subr.bf16.mxu1 %v4804_v2  ;;  %3178 = vmatprep.subr.bf16.mxu0 %v4807_v38  ;;  %v4885_v2 = vld [vmem:[#allocation8 + $0x42c] ss:$16 sps:$4 sm:$0xff]   ;;  %v4880_v38 = vld [vmem:[#allocation8 + $0x420] ss:$16 sps:$4 sm:$0xff]  }
 0x364   : > { %3015 = vmatpush1.bf16.msra.mxu1 %v4802_v3  ;;  %3179 = vmatpush1.bf16.msra.mxu0 %v4805_v4  ;;  %v4883_v3 = vld [vmem:[#allocation8 + $0x428] ss:$16 sps:$4 sm:$0xff]   ;;  %v4888_v4 = vld [vmem:[#allocation8 + $0x444] ss:$16 sps:$4 sm:$0xff]  }
 0x365   : > { %3016 = vmatprep.subr.bf16.mxu1 %v4810_v5  ;;  %3180 = vmatprep.subr.bf16.mxu0 %v4813_v6  ;;  %v4891_v5 = vld [vmem:[#allocation8 + $0x44c] ss:$16 sps:$4 sm:$0xff]   ;;  %v4886_v6 = vld [vmem:[#allocation8 + $0x440] ss:$16 sps:$4 sm:$0xff]  }
 0x368   : > { %3017 = vmatpush1.bf16.msra.mxu1 %v4808_v7  ;;  %3181 = vmatpush1.bf16.msra.mxu0 %v4811_v8  ;;  %v4889_v7 = vld [vmem:[#allocation8 + $0x448] ss:$16 sps:$4 sm:$0xff]   ;;  %v4894_v8 = vld [vmem:[#allocation8 + $0x464] ss:$16 sps:$4 sm:$0xff]  }
 0x369   : > { %3018 = vmatprep.subr.bf16.mxu1 %v4816_v9  ;;  %3182 = vmatprep.subr.bf16.mxu0 %v4819_v13  ;;  %v4897_v9 = vld [vmem:[#allocation8 + $0x46c] ss:$16 sps:$4 sm:$0xff]   ;;  %v4892_v13 = vld [vmem:[#allocation8 + $0x460] ss:$16 sps:$4 sm:$0xff]  }
 0x36c   : > { %3019 = vmatpush1.bf16.msra.mxu1 %v4814_v62  ;;  %3183 = vmatpush1.bf16.msra.mxu0 %v4817_v14  ;;  %v4895_v62 = vld [vmem:[#allocation8 + $0x468] ss:$16 sps:$4 sm:$0xff]   ;;  %v4900_v14 = vld [vmem:[#allocation8 + $0x484] ss:$16 sps:$4 sm:$0xff]  }
 0x36d   : > { %3020 = vmatprep.subr.bf16.mxu1 %v4822_v15  ;;  %3184 = vmatprep.subr.bf16.mxu0 %v4825_v16  ;;  %v4903_v15 = vld [vmem:[#allocation8 + $0x48c] ss:$16 sps:$4 sm:$0xff]   ;;  %v4898_v16 = vld [vmem:[#allocation8 + $0x480] ss:$16 sps:$4 sm:$0xff]  }
 0x370   : > { %3021 = vmatpush1.bf16.msra.mxu1 %v4820_v17  ;;  %3185 = vmatpush1.bf16.msra.mxu0 %v4823_v18  ;;  %v4901_v17 = vld [vmem:[#allocation8 + $0x488] ss:$16 sps:$4 sm:$0xff]   ;;  %v4906_v18 = vld [vmem:[#allocation8 + $0x4a4] ss:$16 sps:$4 sm:$0xff]  }
 0x371   : > { %3022 = vmatprep.subr.bf16.mxu1 %v4828_v19  ;;  %3186 = vmatprep.subr.bf16.mxu0 %v4831_v20  ;;  %v4909_v19 = vld [vmem:[#allocation8 + $0x4ac] ss:$16 sps:$4 sm:$0xff]   ;;  %v4904_v20 = vld [vmem:[#allocation8 + $0x4a0] ss:$16 sps:$4 sm:$0xff]  }
 0x374   : > { %3023 = vmatpush1.bf16.msra.mxu1 %v4826_v21  ;;  %3187 = vmatpush1.bf16.msra.mxu0 %v4829_v22  ;;  %v4907_v21 = vld [vmem:[#allocation8 + $0x4a8] ss:$16 sps:$4 sm:$0xff]   ;;  %v4912_v22 = vld [vmem:[#allocation8 + $0x4c4] ss:$16 sps:$4 sm:$0xff]  }
 0x375   : > { %3024 = vmatprep.subr.bf16.mxu1 %v4834_v23  ;;  %3188 = vmatprep.subr.bf16.mxu0 %v4837_v24  ;;  %v4915_v23 = vld [vmem:[#allocation8 + $0x4cc] ss:$16 sps:$4 sm:$0xff]   ;;  %v4910_v24 = vld [vmem:[#allocation8 + $0x4c0] ss:$16 sps:$4 sm:$0xff]  }
 0x378   : > { %3025 = vmatpush1.bf16.msra.mxu1 %v4832_v10  ;;  %3189 = vmatpush1.bf16.msra.mxu0 %v4835_v11  ;;  %v4913_v10 = vld [vmem:[#allocation8 + $0x4c8] ss:$16 sps:$4 sm:$0xff]   ;;  %v4918_v11 = vld [vmem:[#allocation8 + $0x4e4] ss:$16 sps:$4 sm:$0xff]  }
 0x379   : > { %3026 = vmatprep.subr.bf16.mxu1 %v4840_v12  ;;  %3190 = vmatprep.subr.bf16.mxu0 %v4843_v25  ;;  %v4921_v12 = vld [vmem:[#allocation8 + $0x4ec] ss:$16 sps:$4 sm:$0xff]   ;;  %v4916_v25 = vld [vmem:[#allocation8 + $0x4e0] ss:$16 sps:$4 sm:$0xff]  }
 0x37c   : > { %3027 = vmatpush1.bf16.msra.mxu1 %v4838_v26  ;;  %3191 = vmatpush1.bf16.msra.mxu0 %v4841_v27  ;;  %v4919_v26 = vld [vmem:[#allocation8 + $0x4e8] ss:$16 sps:$4 sm:$0xff]   ;;  %v4924_v27 = vld [vmem:[#allocation8 + $0x504] ss:$16 sps:$4 sm:$0xff]  }
 0x37d   : > { %3028 = vmatprep.subr.bf16.mxu1 %v4846_v28  ;;  %3192 = vmatprep.subr.bf16.mxu0 %v4849_v29  ;;  %v4927_v28 = vld [vmem:[#allocation8 + $0x50c] ss:$16 sps:$4 sm:$0xff]   ;;  %v4922_v29 = vld [vmem:[#allocation8 + $0x500] ss:$16 sps:$4 sm:$0xff]  }
 0x380   : > { %3029 = vmatpush1.bf16.msra.mxu1 %v4844_v30  ;;  %3193 = vmatpush1.bf16.msra.mxu0 %v4847_v31  ;;  %v4925_v30 = vld [vmem:[#allocation8 + $0x508] ss:$16 sps:$4 sm:$0xff]   ;;  %v4930_v31 = vld [vmem:[#allocation8 + $0x524] ss:$16 sps:$4 sm:$0xff]  }
 0x381   : > { %3030 = vmatprep.subr.bf16.mxu1 %v4852_v32  ;;  %3194 = vmatprep.subr.bf16.mxu0 %v4855_v33  ;;  %v4933_v32 = vld [vmem:[#allocation8 + $0x52c] ss:$16 sps:$4 sm:$0xff]   ;;  %v4928_v33 = vld [vmem:[#allocation8 + $0x520] ss:$16 sps:$4 sm:$0xff]  }
 0x384   : > { %3031 = vmatpush1.bf16.msra.mxu1 %v4850_v34  ;;  %3195 = vmatpush1.bf16.msra.mxu0 %v4853_v35  ;;  %v4931_v34 = vld [vmem:[#allocation8 + $0x528] ss:$16 sps:$4 sm:$0xff]   ;;  %v4936_v35 = vld [vmem:[#allocation8 + $0x544] ss:$16 sps:$4 sm:$0xff]  }
 0x385   : > { %3032 = vmatprep.subr.bf16.mxu1 %v4858_v36  ;;  %3196 = vmatprep.subr.bf16.mxu0 %v4861_v37  ;;  %v4939_v36 = vld [vmem:[#allocation8 + $0x54c] ss:$16 sps:$4 sm:$0xff]   ;;  %v4934_v37 = vld [vmem:[#allocation8 + $0x540] ss:$16 sps:$4 sm:$0xff]  }
 0x388   : > { %3033 = vmatpush1.bf16.msra.mxu1 %v4856_v45  ;;  %3197 = vmatpush1.bf16.msra.mxu0 %v4859_v46  ;;  %v4937_v45 = vld [vmem:[#allocation8 + $0x548] ss:$16 sps:$4 sm:$0xff]   ;;  %v4942_v46 = vld [vmem:[#allocation8 + $0x564] ss:$16 sps:$4 sm:$0xff]  }
 0x389   : > { %3034 = vmatprep.subr.bf16.mxu1 %v4864_v47  ;;  %3198 = vmatprep.subr.bf16.mxu0 %v4867_v48  ;;  %v4945_v47 = vld [vmem:[#allocation8 + $0x56c] ss:$16 sps:$4 sm:$0xff]   ;;  %v4940_v48 = vld [vmem:[#allocation8 + $0x560] ss:$16 sps:$4 sm:$0xff]  }
 0x38c   : > { %3035 = vmatpush1.bf16.msra.mxu1 %v4862_v49  ;;  %3199 = vmatpush1.bf16.msra.mxu0 %v4865_v50  ;;  %v4943_v49 = vld [vmem:[#allocation8 + $0x568] ss:$16 sps:$4 sm:$0xff]   ;;  %v4948_v50 = vld [vmem:[#allocation8 + $0x584] ss:$16 sps:$4 sm:$0xff]  }
 0x38d   : > { %3036 = vmatprep.subr.bf16.mxu1 %v4870_v51  ;;  %3200 = vmatprep.subr.bf16.mxu0 %v4873_v52  ;;  %v4951_v51 = vld [vmem:[#allocation8 + $0x58c] ss:$16 sps:$4 sm:$0xff]   ;;  %v4946_v52 = vld [vmem:[#allocation8 + $0x580] ss:$16 sps:$4 sm:$0xff]  }
 0x390   : > { %3037 = vmatpush1.bf16.msra.mxu1 %v4868_v53  ;;  %3201 = vmatpush1.bf16.msra.mxu0 %v4871_v54  ;;  %v4954_v53 = vld [vmem:[#allocation8 + $0x5a4] ss:$16 sps:$4 sm:$0xff]   ;;  %v4957_v54 = vld [vmem:[#allocation8 + $0x5ac] ss:$16 sps:$4 sm:$0xff]  }
 0x391   : > { %3047 = vmatprep.subr.bf16.mxu1 %v4876_v56  ;;  %3211 = vmatprep.subr.bf16.mxu0 %v4879_v57  ;;  %v4955_v56 = vld [vmem:[#allocation8 + $0x5a8] ss:$16 sps:$4 sm:$0xff]   ;;  %v4960_v57 = vld [vmem:[#allocation8 + $0x5c4] ss:$16 sps:$4 sm:$0xff]  }
 0x393   : > { %3039 = vmatmul.mubr.bf16.vlgmr.msra.gmra.mrb[4].mxu1 %v1401_v60  ;;  %3203 = vmatmul.mubr.bf16.vlgmr.msra.gmra.mrb[16].mxu0 %v1401_v60  ;;  %v4961_v60 = vld [vmem:[#allocation8 + $0x5c8] ss:$16 sps:$4 sm:$0xff]  }
 0x394   : > { %3048 = vmatpush1.bf16.msra.mxu1 %v4874_v59  ;;  %3079 = vmatprep.mubr.bf16.mxu1 %v1404_v63  ;;  %v4958_v59 = vld [vmem:[#allocation8 + $0x5c0] ss:$16 sps:$4 sm:$0xff]  }
 0x395   : > { %3212 = vmatpush1.bf16.msra.mxu0 %v4877_v61  ;;  %3243 = vmatprep.mubr.bf16.mxu0 %v1404_v63  ;;  %v4966_v61 = vld [vmem:[#allocation8 + $0x5e4] ss:$16 sps:$4 sm:$0xff]   ;;  %v1377_v63 = vsub.s32 4, %v5696_v39 }
 0x396   : > { %3049 = vmatprep.subr.bf16.mxu1 %v4882_v0  ;;  %3213 = vmatprep.subr.bf16.mxu0 %v4885_v2  ;;  %v4969_v0 = vld [vmem:[#allocation8 + $0x5ec] ss:$16 sps:$4 sm:$0xff]   ;;  %v1389_v2 = vsub.s32 7, %v5696_v39 }
 0x398   : > { %3050 = vmatpush1.bf16.msra.mxu1 %v4880_v38  ;;  %v4964_v38 = vld [vmem:[#allocation8 + $0x5e0] ss:$16 sps:$4 sm:$0xff]  }
 0x399   : > { %3214 = vmatpush1.bf16.msra.mxu0 %v4883_v3  ;;  %3051 = vmatprep.subr.bf16.mxu1 %v4888_v4  ;;  %v4967_v3 = vld [vmem:[#allocation8 + $0x5e8] ss:$16 sps:$4 sm:$0xff]   ;;  %v1378_v4 = vrot.slane %v5746_v44, %v1377_v63  ;;  %v5047_v63 = vld [vmem:[#allocation8 + $0x78c] ss:$16 sps:$4 sm:$0xff]  }
 0x39a   : > { %3215 = vmatprep.subr.bf16.mxu0 %v4891_v5  ;;  %v4972_v5 = vld [vmem:[#allocation8 + $0x604] ss:$16 sps:$4 sm:$0xff]  }
 0x39c   : > { %3052 = vmatpush1.bf16.msra.mxu1 %v4886_v6  ;;  %v4975_v6 = vld [vmem:[#allocation8 + $0x60c] ss:$16 sps:$4 sm:$0xff]  }
 0x39d   : > { %3216 = vmatpush1.bf16.msra.mxu0 %v4889_v7  ;;  %3053 = vmatprep.subr.bf16.mxu1 %v4894_v8  ;;  %v1390_v7 = vrot.slane %v5746_v44, %v1389_v2  ;;  %v4970_v8 = vld [vmem:[#allocation8 + $0x600] ss:$16 sps:$4 sm:$0xff]   ;;  %v5045_v2 = vld [vmem:[#allocation8 + $0x788] ss:$16 sps:$4 sm:$0xff]  }
 0x39e   : > { %3217 = vmatprep.subr.bf16.mxu0 %v4897_v9  ;;  %v1403_v9 = vpack.c.bf16 %v1378_v4, %v1378_v4  ;;  %v5048_v4 = vld [vmem:[#allocation8 + $0x7a0] ss:$16 sps:$4 sm:$0xff]  }
 0x3a0   : > { %3054 = vmatpush1.bf16.msra.mxu1 %v4892_v13  ;;  %v4973_v13 = vld [vmem:[#allocation8 + $0x608] ss:$16 sps:$4 sm:$0xff]  }
 0x3a1   : > { %3218 = vmatpush1.bf16.msra.mxu0 %v4895_v62  ;;  %3055 = vmatprep.subr.bf16.mxu1 %v4900_v14  ;;  %v4978_v62 = vld [vmem:[#allocation8 + $0x624] ss:$16 sps:$4 sm:$0xff]   ;;  %v1406_v14 = vpack.c.bf16 %v1390_v7, %v1390_v7  ;;  %v5059_v7 = vld [vmem:[#allocation8 + $0x7cc] ss:$16 sps:$4 sm:$0xff]  }
 0x3a2   : > { %3219 = vmatprep.subr.bf16.mxu0 %v4903_v15  ;;  %v4981_v15 = vld [vmem:[#allocation8 + $0x62c] ss:$16 sps:$4 sm:$0xff]  }
 0x3a4   : > { %3056 = vmatpush1.bf16.msra.mxu1 %v4898_v16  ;;  %v4976_v16 = vld [vmem:[#allocation8 + $0x620] ss:$16 sps:$4 sm:$0xff]  }
 0x3a5   : > { %3220 = vmatpush1.bf16.msra.mxu0 %v4901_v17  ;;  %3057 = vmatprep.subr.bf16.mxu1 %v4906_v18  ;;  %v4979_v17 = vld [vmem:[#allocation8 + $0x628] ss:$16 sps:$4 sm:$0xff]   ;;  %v4984_v18 = vld [vmem:[#allocation8 + $0x644] ss:$16 sps:$4 sm:$0xff]  }
 0x3a6   : > { %3221 = vmatprep.subr.bf16.mxu0 %v4909_v19  ;;  %v4987_v19 = vld [vmem:[#allocation8 + $0x64c] ss:$16 sps:$4 sm:$0xff]  }
 0x3a8   : > { %3058 = vmatpush1.bf16.msra.mxu1 %v4904_v20  ;;  %v4982_v20 = vld [vmem:[#allocation8 + $0x640] ss:$16 sps:$4 sm:$0xff]  }
 0x3a9   : > { %3222 = vmatpush1.bf16.msra.mxu0 %v4907_v21  ;;  %3059 = vmatprep.subr.bf16.mxu1 %v4912_v22  ;;  %v4985_v21 = vld [vmem:[#allocation8 + $0x648] ss:$16 sps:$4 sm:$0xff]   ;;  %v4990_v22 = vld [vmem:[#allocation8 + $0x664] ss:$16 sps:$4 sm:$0xff]  }
 0x3aa   : > { %3223 = vmatprep.subr.bf16.mxu0 %v4915_v23  ;;  %v4993_v23 = vld [vmem:[#allocation8 + $0x66c] ss:$16 sps:$4 sm:$0xff]  }
 0x3ac   : > { %3060 = vmatpush1.bf16.msra.mxu1 %v4910_v24  ;;  %v4988_v24 = vld [vmem:[#allocation8 + $0x660] ss:$16 sps:$4 sm:$0xff]  }
 0x3ad   : > { %3224 = vmatpush1.bf16.msra.mxu0 %v4913_v10  ;;  %3061 = vmatprep.subr.bf16.mxu1 %v4918_v11  ;;  %v4991_v10 = vld [vmem:[#allocation8 + $0x668] ss:$16 sps:$4 sm:$0xff]   ;;  %v4996_v11 = vld [vmem:[#allocation8 + $0x684] ss:$16 sps:$4 sm:$0xff]  }
 0x3ae   : > { %3225 = vmatprep.subr.bf16.mxu0 %v4921_v12  ;;  %v4999_v12 = vld [vmem:[#allocation8 + $0x68c] ss:$16 sps:$4 sm:$0xff]  }
 0x3b0   : > { %3062 = vmatpush1.bf16.msra.mxu1 %v4916_v25  ;;  %v4994_v25 = vld [vmem:[#allocation8 + $0x680] ss:$16 sps:$4 sm:$0xff]  }
 0x3b1   : > { %3226 = vmatpush1.bf16.msra.mxu0 %v4919_v26  ;;  %3063 = vmatprep.subr.bf16.mxu1 %v4924_v27  ;;  %v4997_v26 = vld [vmem:[#allocation8 + $0x688] ss:$16 sps:$4 sm:$0xff]   ;;  %v5002_v27 = vld [vmem:[#allocation8 + $0x6a4] ss:$16 sps:$4 sm:$0xff]  }
 0x3b2   : > { %3227 = vmatprep.subr.bf16.mxu0 %v4927_v28  ;;  %v5005_v28 = vld [vmem:[#allocation8 + $0x6ac] ss:$16 sps:$4 sm:$0xff]  }
 0x3b4   : > { %3064 = vmatpush1.bf16.msra.mxu1 %v4922_v29  ;;  %v5000_v29 = vld [vmem:[#allocation8 + $0x6a0] ss:$16 sps:$4 sm:$0xff]  }
 0x3b5   : > { %3228 = vmatpush1.bf16.msra.mxu0 %v4925_v30  ;;  %3065 = vmatprep.subr.bf16.mxu1 %v4930_v31  ;;  %v5003_v30 = vld [vmem:[#allocation8 + $0x6a8] ss:$16 sps:$4 sm:$0xff]   ;;  %v5008_v31 = vld [vmem:[#allocation8 + $0x6c4] ss:$16 sps:$4 sm:$0xff]  }
 0x3b6   : > { %3229 = vmatprep.subr.bf16.mxu0 %v4933_v32  ;;  %v5011_v32 = vld [vmem:[#allocation8 + $0x6cc] ss:$16 sps:$4 sm:$0xff]  }
 0x3b8   : > { %3066 = vmatpush1.bf16.msra.mxu1 %v4928_v33  ;;  %v5006_v33 = vld [vmem:[#allocation8 + $0x6c0] ss:$16 sps:$4 sm:$0xff]  }
 0x3b9   : > { %3230 = vmatpush1.bf16.msra.mxu0 %v4931_v34  ;;  %3067 = vmatprep.subr.bf16.mxu1 %v4936_v35  ;;  %v5009_v34 = vld [vmem:[#allocation8 + $0x6c8] ss:$16 sps:$4 sm:$0xff]   ;;  %v5014_v35 = vld [vmem:[#allocation8 + $0x6e4] ss:$16 sps:$4 sm:$0xff]  }
 0x3ba   : > { %3231 = vmatprep.subr.bf16.mxu0 %v4939_v36  ;;  %v5017_v36 = vld [vmem:[#allocation8 + $0x6ec] ss:$16 sps:$4 sm:$0xff]  }
 0x3bc   : > { %3068 = vmatpush1.bf16.msra.mxu1 %v4934_v37  ;;  %v5012_v37 = vld [vmem:[#allocation8 + $0x6e0] ss:$16 sps:$4 sm:$0xff]  }
 0x3bd   : > { %3232 = vmatpush1.bf16.msra.mxu0 %v4937_v45  ;;  %3069 = vmatprep.subr.bf16.mxu1 %v4942_v46  ;;  %v5015_v45 = vld [vmem:[#allocation8 + $0x6e8] ss:$16 sps:$4 sm:$0xff]   ;;  %v5020_v46 = vld [vmem:[#allocation8 + $0x704] ss:$16 sps:$4 sm:$0xff]  }
 0x3be   : > { %3233 = vmatprep.subr.bf16.mxu0 %v4945_v47  ;;  %v5023_v47 = vld [vmem:[#allocation8 + $0x70c] ss:$16 sps:$4 sm:$0xff]  }
 0x3c0   : > { %3070 = vmatpush1.bf16.msra.mxu1 %v4940_v48  ;;  %v5018_v48 = vld [vmem:[#allocation8 + $0x700] ss:$16 sps:$4 sm:$0xff]  }
 0x3c1   : > { %3234 = vmatpush1.bf16.msra.mxu0 %v4943_v49  ;;  %3071 = vmatprep.subr.bf16.mxu1 %v4948_v50  ;;  %v5021_v49 = vld [vmem:[#allocation8 + $0x708] ss:$16 sps:$4 sm:$0xff]   ;;  %v5026_v50 = vld [vmem:[#allocation8 + $0x724] ss:$16 sps:$4 sm:$0xff]  }
 0x3c2   : > { %3235 = vmatprep.subr.bf16.mxu0 %v4951_v51  ;;  %v5029_v51 = vld [vmem:[#allocation8 + $0x72c] ss:$16 sps:$4 sm:$0xff]  }
 0x3c4   : > { %3072 = vmatpush1.bf16.msra.mxu1 %v4946_v52  ;;  %v5024_v52 = vld [vmem:[#allocation8 + $0x720] ss:$16 sps:$4 sm:$0xff]  }
 0x3c5   : > { %3236 = vmatpush1.bf16.msra.mxu0 %v4949_v1  ;;  %3073 = vmatprep.subr.bf16.mxu1 %v4954_v53  ;;  %v5027_v1 = vld [vmem:[#allocation8 + $0x728] ss:$16 sps:$4 sm:$0xff]   ;;  %v5032_v53 = vld [vmem:[#allocation8 + $0x744] ss:$16 sps:$4 sm:$0xff]  }
 0x3c6   : > { %3237 = vmatprep.subr.bf16.mxu0 %v4957_v54  ;;  %v5035_v54 = vld [vmem:[#allocation8 + $0x74c] ss:$16 sps:$4 sm:$0xff]  }
 0x3c8   : > { %3074 = vmatpush1.bf16.msra.mxu1 %v4952_v55  ;;  %v5030_v55 = vld [vmem:[#allocation8 + $0x740] ss:$16 sps:$4 sm:$0xff]  }
 0x3c9   : > { %3238 = vmatpush1.bf16.msra.mxu0 %v4955_v56  ;;  %3075 = vmatprep.subr.bf16.mxu1 %v4960_v57  ;;  %v5033_v56 = vld [vmem:[#allocation8 + $0x748] ss:$16 sps:$4 sm:$0xff]   ;;  %v5038_v57 = vld [vmem:[#allocation8 + $0x764] ss:$16 sps:$4 sm:$0xff]  }
 0x3ca   : > { %3239 = vmatprep.subr.bf16.mxu0 %v4963_v58  ;;  %v5041_v58 = vld [vmem:[#allocation8 + $0x76c] ss:$16 sps:$4 sm:$0xff]  }
 0x3cc   : > { %3076 = vmatpush1.bf16.msra.mxu1 %v4958_v59  ;;  %v5036_v59 = vld [vmem:[#allocation8 + $0x760] ss:$16 sps:$4 sm:$0xff]  }
 0x3cd   : > { %3240 = vmatpush1.bf16.msra.mxu0 %v4961_v60  ;;  %3077 = vmatprep.subr.bf16.mxu1 %v4966_v61  ;;  %v5039_v60 = vld [vmem:[#allocation8 + $0x768] ss:$16 sps:$4 sm:$0xff]   ;;  %v5044_v61 = vld [vmem:[#allocation8 + $0x784] ss:$16 sps:$4 sm:$0xff]  }
 0x3ce   : > { %3241 = vmatprep.subr.bf16.mxu0 %v4969_v0  ;;  %v5042_v0 = vld [vmem:[#allocation8 + $0x780] ss:$16 sps:$4 sm:$0xff]  }
 0x3d0   : > { %3078 = vmatpush1.bf16.msra.mxu1 %v4964_v38  ;;  %v5050_v38 = vld [vmem:[#allocation8 + $0x7a4] ss:$16 sps:$4 sm:$0xff]  }
 0x3d1   : > { %3242 = vmatpush1.bf16.msra.mxu0 %v4967_v3  ;;  %3088 = vmatprep.subr.bf16.mxu1 %v4972_v5  ;;  %v5053_v3 = vld [vmem:[#allocation8 + $0x7ac] ss:$16 sps:$4 sm:$0xff]   ;;  %v5051_v5 = vld [vmem:[#allocation8 + $0x7a8] ss:$16 sps:$4 sm:$0xff]  }
 0x3d2   : > { %3252 = vmatprep.subr.bf16.mxu0 %v4975_v6  ;;  %v5056_v6 = vld [vmem:[#allocation8 + $0x7c4] ss:$16 sps:$4 sm:$0xff]  }
 0x3d3   : > { %3080 = vmatmul.mubr.bf16.vlgmr.msra.gmra.mrb[4].mxu1 %v1403_v9 }
 0x3d4   : > { %3244 = vmatmul.mubr.bf16.vlgmr.msra.gmra.mrb[16].mxu0 %v1403_v9  ;;  %3089 = vmatpush1.bf16.msra.mxu1 %v4970_v8  ;;  %v5054_v8 = vld [vmem:[#allocation8 + $0x7c0] ss:$16 sps:$4 sm:$0xff]   ;;  %v5057_v9 = vld [vmem:[#allocation8 + $0x7c8] ss:$16 sps:$4 sm:$0xff]  }
 0x3d5   : > { %3120 = vmatprep.mubr.bf16.mxu1 %v1406_v14  ;;  %3253 = vmatpush1.bf16.msra.mxu0 %v4973_v13  ;;  %v5062_v13 = vld [vmem:[#allocation8 + $0x7e4] ss:$16 sps:$4 sm:$0xff]  }
 0x3d6   : > { %3284 = vmatprep.mubr.bf16.mxu0 %v1406_v14  ;;  %3090 = vmatprep.subr.bf16.mxu1 %v4978_v62  ;;  %v1385_v62 = vsub.s32 6, %v5696_v39  ;;  %v5065_v14 = vld [vmem:[#allocation8 + $0x7ec] ss:$16 sps:$4 sm:$0xff]  }
 0x3d7   : > { %3254 = vmatprep.subr.bf16.mxu0 %v4981_v15  ;;  %v5060_v15 = vld [vmem:[#allocation8 + $0x7e0] ss:$16 sps:$4 sm:$0xff]  }
 0x3d8   : > { %3091 = vmatpush1.bf16.msra.mxu1 %v4976_v16  ;;  %v5063_v16 = vld [vmem:[#allocation8 + $0x7e8] ss:$16 sps:$4 sm:$0xff]  }
 0x3d9   : > { %3255 = vmatpush1.bf16.msra.mxu0 %v4979_v17  ;;  %3092 = vmatprep.subr.bf16.mxu1 %v4984_v18  ;;  %v1386_v17 = vrot.slane %v5746_v44, %v1385_v62  ;;  %v5068_v18 = vld [vmem:[#allocation9 + $0x4] ss:$8 sps:$4 sm:$0xff]   ;;  %v5075_v44 = vld [vmem:[#allocation9 + $0x30] ss:$8 sps:$4 sm:$0xff]  }
 0x3da   : > { %3256 = vmatprep.subr.bf16.mxu0 %v4987_v19  ;;  %v5066_v19 = vld [vmem:[#allocation9] ss:$8 sps:$4 sm:$0xff]  }
 0x3dc   : > { %3093 = vmatpush1.bf16.msra.mxu1 %v4982_v20  ;;  %v1405_v20 = vpack.c.bf16 %v1386_v17, %v1386_v17 }
 0x3dd   : > { %3257 = vmatpush1.bf16.msra.mxu0 %v4985_v21  ;;  %3094 = vmatprep.subr.bf16.mxu1 %v4990_v22  ;;  %v5071_v21 = vld [vmem:[#allocation9 + $0x14] ss:$8 sps:$4 sm:$0xff]   ;;  %v5069_v22 = vld [vmem:[#allocation9 + $0x10] ss:$8 sps:$4 sm:$0xff]  }
 0x3de   : > { %3258 = vmatprep.subr.bf16.mxu0 %v4993_v23  ;;  %v5074_v23 = vld [vmem:[#allocation9 + $0x24] ss:$8 sps:$4 sm:$0xff]  }
 0x3e0   : > { %3095 = vmatpush1.bf16.msra.mxu1 %v4988_v24  ;;  %v5072_v24 = vld [vmem:[#allocation9 + $0x20] ss:$8 sps:$4 sm:$0xff]  }
 0x3e1   : > { %3259 = vmatpush1.bf16.msra.mxu0 %v4991_v10  ;;  %3096 = vmatprep.subr.bf16.mxu1 %v4996_v11  ;;  %v5077_v10 = vld [vmem:[#allocation9 + $0x34] ss:$8 sps:$4 sm:$0xff]   ;;  %v5080_v11 = vld [vmem:[#allocation9 + $0x44] ss:$8 sps:$4 sm:$0xff]  }
 0x3e2   : > { %3260 = vmatprep.subr.bf16.mxu0 %v4999_v12  ;;  %v5078_v12 = vld [vmem:[#allocation9 + $0x40] ss:$8 sps:$4 sm:$0xff]  }
 0x3e4   : > { %3097 = vmatpush1.bf16.msra.mxu1 %v4994_v25  ;;  %v5083_v25 = vld [vmem:[#allocation9 + $0x54] ss:$8 sps:$4 sm:$0xff]  }
 0x3e5   : > { %3261 = vmatpush1.bf16.msra.mxu0 %v4997_v26  ;;  %3098 = vmatprep.subr.bf16.mxu1 %v5002_v27  ;;  %v5081_v26 = vld [vmem:[#allocation9 + $0x50] ss:$8 sps:$4 sm:$0xff]   ;;  %v5086_v27 = vld [vmem:[#allocation9 + $0x64] ss:$8 sps:$4 sm:$0xff]  }
 0x3e6   : > { %3262 = vmatprep.subr.bf16.mxu0 %v5005_v28  ;;  %v5084_v28 = vld [vmem:[#allocation9 + $0x60] ss:$8 sps:$4 sm:$0xff]  }
 0x3e8   : > { %3099 = vmatpush1.bf16.msra.mxu1 %v5000_v29  ;;  %v5089_v29 = vld [vmem:[#allocation9 + $0x74] ss:$8 sps:$4 sm:$0xff]  }
 0x3e9   : > { %3263 = vmatpush1.bf16.msra.mxu0 %v5003_v30  ;;  %3100 = vmatprep.subr.bf16.mxu1 %v5008_v31  ;;  %v5087_v30 = vld [vmem:[#allocation9 + $0x70] ss:$8 sps:$4 sm:$0xff]   ;;  %v5092_v31 = vld [vmem:[#allocation9 + $0x84] ss:$8 sps:$4 sm:$0xff]  }
 0x3ea   : > { %3264 = vmatprep.subr.bf16.mxu0 %v5011_v32  ;;  %v5090_v32 = vld [vmem:[#allocation9 + $0x80] ss:$8 sps:$4 sm:$0xff]  }
 0x3ec   : > { %3101 = vmatpush1.bf16.msra.mxu1 %v5006_v33  ;;  %v5095_v33 = vld [vmem:[#allocation9 + $0x94] ss:$8 sps:$4 sm:$0xff]  }
 0x3ed   : > { %3265 = vmatpush1.bf16.msra.mxu0 %v5009_v34  ;;  %3102 = vmatprep.subr.bf16.mxu1 %v5014_v35  ;;  %v5093_v34 = vld [vmem:[#allocation9 + $0x90] ss:$8 sps:$4 sm:$0xff]   ;;  %v5098_v35 = vld [vmem:[#allocation9 + $0xa4] ss:$8 sps:$4 sm:$0xff]  }
 0x3ee   : > { %3266 = vmatprep.subr.bf16.mxu0 %v5017_v36  ;;  %v5096_v36 = vld [vmem:[#allocation9 + $0xa0] ss:$8 sps:$4 sm:$0xff]  }
 0x3f0   : > { %3103 = vmatpush1.bf16.msra.mxu1 %v5012_v37  ;;  %v5101_v37 = vld [vmem:[#allocation9 + $0xb4] ss:$8 sps:$4 sm:$0xff]  }
 0x3f1   : > { %3267 = vmatpush1.bf16.msra.mxu0 %v5015_v45  ;;  %3104 = vmatprep.subr.bf16.mxu1 %v5020_v46  ;;  %v5099_v45 = vld [vmem:[#allocation9 + $0xb0] ss:$8 sps:$4 sm:$0xff]   ;;  %v5104_v46 = vld [vmem:[#allocation9 + $0xc4] ss:$8 sps:$4 sm:$0xff]  }
 0x3f2   : > { %3268 = vmatprep.subr.bf16.mxu0 %v5023_v47  ;;  %v5102_v47 = vld [vmem:[#allocation9 + $0xc0] ss:$8 sps:$4 sm:$0xff]  }
 0x3f4   : > { %3105 = vmatpush1.bf16.msra.mxu1 %v5018_v48  ;;  %v5107_v48 = vld [vmem:[#allocation9 + $0xd4] ss:$8 sps:$4 sm:$0xff]  }
 0x3f5   : > { %3269 = vmatpush1.bf16.msra.mxu0 %v5021_v49  ;;  %3106 = vmatprep.subr.bf16.mxu1 %v5026_v50  ;;  %v5105_v49 = vld [vmem:[#allocation9 + $0xd0] ss:$8 sps:$4 sm:$0xff]   ;;  %v5110_v50 = vld [vmem:[#allocation9 + $0xe4] ss:$8 sps:$4 sm:$0xff]  }
 0x3f6   : > { %3270 = vmatprep.subr.bf16.mxu0 %v5029_v51  ;;  %v5108_v51 = vld [vmem:[#allocation9 + $0xe0] ss:$8 sps:$4 sm:$0xff]  }
 0x3f8   : > { %3107 = vmatpush1.bf16.msra.mxu1 %v5024_v52  ;;  %v5113_v52 = vld [vmem:[#allocation9 + $0xf4] ss:$8 sps:$4 sm:$0xff]  }
 0x3f9   : > { %3271 = vmatpush1.bf16.msra.mxu0 %v5027_v1  ;;  %3108 = vmatprep.subr.bf16.mxu1 %v5032_v53  ;;  %v5111_v1 = vld [vmem:[#allocation9 + $0xf0] ss:$8 sps:$4 sm:$0xff]   ;;  %v5116_v53 = vld [vmem:[#allocation9 + $0x104] ss:$8 sps:$4 sm:$0xff]  }
 0x3fa   : > { %3272 = vmatprep.subr.bf16.mxu0 %v5035_v54  ;;  %v5162_v54 = vld [vmem:[#allocation11 + $0x40] sm:$0xff]  }
 0x3fc   : > { %3109 = vmatpush1.bf16.msra.mxu1 %v5030_v55  ;;  %v5163_v55 = vld [vmem:[#allocation11] sm:$0xff]  }
 0x3fd   : > { %3273 = vmatpush1.bf16.msra.mxu0 %v5033_v56  ;;  %3110 = vmatprep.subr.bf16.mxu1 %v5038_v57  ;;  %v5164_v56 = vld [vmem:[#allocation11 + $0x48] sm:$0xff]  }
 0x3fe   : > { %3274 = vmatprep.subr.bf16.mxu0 %v5041_v58  ;;  %v5165_v57 = vld [vmem:[#allocation11 + $0x8] sm:$0xff]   ;;  %v5166_v58 = vld [vmem:[#allocation11 + $0x50] sm:$0xff]  }
 0x400   : > { %3111 = vmatpush1.bf16.msra.mxu1 %v5036_v59  ;;  %v5167_v59 = vld [vmem:[#allocation11 + $0x10] sm:$0xff]  }
 0x401   : > { %3275 = vmatpush1.bf16.msra.mxu0 %v5039_v60  ;;  %3112 = vmatprep.subr.bf16.mxu1 %v5044_v61  ;;  %v5168_v60 = vld [vmem:[#allocation11 + $0x58] sm:$0xff]  }
 0x402   : > { %3276 = vmatprep.subr.bf16.mxu0 %v5047_v63  ;;  %v5169_v61 = vld [vmem:[#allocation11 + $0x18] sm:$0xff]   ;;  %v5170_v63 = vld [vmem:[#allocation11 + $0x60] sm:$0xff]  }
 0x404   : > { %3113 = vmatpush1.bf16.msra.mxu1 %v5042_v0  ;;  %v5171_v0 = vld [vmem:[#allocation11 + $0x20] sm:$0xff]  }
 0x405   : > { %3277 = vmatpush1.bf16.msra.mxu0 %v5045_v2  ;;  %3114 = vmatprep.subr.bf16.mxu1 %v5050_v38  ;;  %v5172_v2 = vld [vmem:[#allocation11 + $0x68] sm:$0xff]  }
 0x406   : > { %3278 = vmatprep.subr.bf16.mxu0 %v5053_v3  ;;  %v5173_v38 = vld [vmem:[#allocation11 + $0x28] sm:$0xff]  }
 0x407   : > { %v5768_v3 = vld [vmem:[%s5845_s8] sm:$0xf] }
 0x408   : > { %3115 = vmatpush1.bf16.msra.mxu1 %v5048_v4  ;;  %v2948_v4 = vrot.slane %v5768_v3, %v5702_v41 }
 0x409   : > { %3279 = vmatpush1.bf16.msra.mxu0 %v5051_v5  ;;  %3116 = vmatprep.subr.bf16.mxu1 %v5056_v6  ;;  %v2952_v5 = vrot.slane %v5768_v3, %v5699_v40  ;;  %v2960_v6 = vrot.slane %v5768_v3, %v1373_v43 }
 0x40a   : > { %3280 = vmatprep.subr.bf16.mxu0 %v5059_v7 }
 0x40c   : > { %3117 = vmatpush1.bf16.msra.mxu1 %v5054_v8 }
 0x40d   : > { %3281 = vmatpush1.bf16.msra.mxu0 %v5057_v9  ;;  %3118 = vmatprep.subr.bf16.mxu1 %v5062_v13 }
 0x40e   : > { %3282 = vmatprep.subr.bf16.mxu0 %v5065_v14 }
 0x410   : > { %3119 = vmatpush1.bf16.msra.mxu1 %v5060_v15 }
 0x411   : > { %3283 = vmatpush1.bf16.msra.mxu0 %v5063_v16  ;;  %3697 = vmatprep.subr.bf16.mxu1 %v5068_v18 }
 0x412   : > { %4502 = vmatprep.subr.bf16.mxu0 %v5162_v54  ;;  %v5158_v54 = vld [vmem:[#allocation9 + $0x1e4] ss:$8 sps:$4 sm:$0xff]  }
 0x413   : > { %3121 = vmatmul.mubr.bf16.vlgmr.msra.gmra.mrb[4].mxu1 %v1405_v20 }
 0x414   : > { %3285 = vmatmul.mubr.bf16.vlgmr.msra.gmra.mrb[16].mxu0 %v1405_v20  ;;  %3698 = vmatpush1.bf16.msra.mxu1 %v5066_v19 }
 0x415   : > { %3699 = vmatprep.subr.bf16.mxu1 %v5071_v21  ;;  %4503 = vmatpush3.bf16.msra.mxu0 %v5163_v55  ;;  %v5156_v55 = vld [vmem:[#allocation9 + $0x1e0] ss:$8 sps:$4 sm:$0xff]  }
 0x416   : > { %4504 = vmatprep.subr.bf16.mxu0 %v5164_v56 }
 0x418   : > { %3700 = vmatpush1.bf16.msra.mxu1 %v5069_v22 }
 0x419   : > { %3701 = vmatprep.subr.bf16.mxu1 %v5074_v23  ;;  %4505 = vmatpush3.bf16.msra.mxu0 %v5165_v57  ;;  %v5161_v57 = vld [vmem:[#allocation9 + $0x1f4] ss:$8 sps:$4 sm:$0xff]  }
 0x41a   : > { %4506 = vmatprep.subr.bf16.mxu0 %v5166_v58  ;;  %v5159_v58 = vld [vmem:[#allocation9 + $0x1f0] ss:$8 sps:$4 sm:$0xff]  }
 0x41c   : > { %3702 = vmatpush1.bf16.msra.mxu1 %v5072_v24  ;;  %v5114_v24 = vld [vmem:[#allocation9 + $0x100] ss:$8 sps:$4 sm:$0xff]  }
 0x41d   : > { %3703 = vmatprep.subr.bf16.mxu1 %v5077_v10  ;;  %4507 = vmatpush3.bf16.msra.mxu0 %v5167_v59  ;;  %v5119_v10 = vld [vmem:[#allocation9 + $0x114] ss:$8 sps:$4 sm:$0xff]  }
 0x41e   : > { %4508 = vmatprep.subr.bf16.mxu0 %v5168_v60 }
 0x420   : > { %3704 = vmatpush1.bf16.msra.mxu1 %v5075_v44  ;;  %v5117_v44 = vld [vmem:[#allocation9 + $0x110] ss:$8 sps:$4 sm:$0xff]  }
 0x421   : > { %3705 = vmatprep.subr.bf16.mxu1 %v5080_v11  ;;  %4509 = vmatpush3.bf16.msra.mxu0 %v5169_v61  ;;  %v5122_v11 = vld [vmem:[#allocation9 + $0x124] ss:$8 sps:$4 sm:$0xff]   ;;  %v5174_v61 = vld [vmem:[#allocation11 + $0x70] sm:$0xff]  }
 0x422   : > { %4510 = vmatprep.subr.bf16.mxu0 %v5170_v63  ;;  %v5175_v63 = vld [vmem:[#allocation11 + $0x30] sm:$0xff]  }
 0x424   : > { %3706 = vmatpush1.bf16.msra.mxu1 %v5078_v12  ;;  %v5120_v12 = vld [vmem:[#allocation9 + $0x120] ss:$8 sps:$4 sm:$0xff]  }
 0x425   : > { %3707 = vmatprep.subr.bf16.mxu1 %v5083_v25  ;;  %4511 = vmatpush3.bf16.msra.mxu0 %v5171_v0  ;;  %v5125_v25 = vld [vmem:[#allocation9 + $0x134] ss:$8 sps:$4 sm:$0xff]  }
 0x426   : > { %4512 = vmatprep.subr.bf16.mxu0 %v5172_v2  ;;  %v5177_v0 = vld [vmem:[#allocation11 + $0x38] sm:$0xff]   ;;  %v3365_v2 = vld [vmem:[%s5847_s10] sm:$0x3] }
 0x428   : > { %3708 = vmatpush1.bf16.msra.mxu1 %v5081_v26  ;;  %v5123_v26 = vld [vmem:[#allocation9 + $0x130] ss:$8 sps:$4 sm:$0xff]  }
 0x429   : > { %3709 = vmatprep.subr.bf16.mxu1 %v5086_v27  ;;  %4513 = vmatpush3.bf16.msra.mxu0 %v5173_v38  ;;  %v5128_v27 = vld [vmem:[#allocation9 + $0x144] ss:$8 sps:$4 sm:$0xff]   ;;  %v3690_v38 = vrot.slane %v3365_v2, %v5702_v41 }
 0x42a   : > { %4514 = vmatprep.subr.bf16.mxu0 %v5174_v61 }
 0x42c   : > { %3710 = vmatpush1.bf16.msra.mxu1 %v5084_v28  ;;  %v5126_v28 = vld [vmem:[#allocation9 + $0x140] ss:$8 sps:$4 sm:$0xff]  }
 0x42d   : > { %3711 = vmatprep.subr.bf16.mxu1 %v5089_v29  ;;  %v5131_v29 = vld [vmem:[#allocation9 + $0x154] ss:$8 sps:$4 sm:$0xff]   ;;  %4515 = vmatpush3.bf16.msra.mxu0 %v5175_v63 }
 0x430   : > { %3712 = vmatpush1.bf16.msra.mxu1 %v5087_v30  ;;  %v5129_v30 = vld [vmem:[#allocation9 + $0x150] ss:$8 sps:$4 sm:$0xff]  }
 0x431   : > { %3713 = vmatprep.subr.bf16.mxu1 %v5092_v31  ;;  %v5134_v31 = vld [vmem:[#allocation9 + $0x164] ss:$8 sps:$4 sm:$0xff]  }
 0x434   : > { %3714 = vmatpush1.bf16.msra.mxu1 %v5090_v32  ;;  %v5132_v32 = vld [vmem:[#allocation9 + $0x160] ss:$8 sps:$4 sm:$0xff]  }
 0x435   : > { %3715 = vmatprep.subr.bf16.mxu1 %v5095_v33  ;;  %v5137_v33 = vld [vmem:[#allocation9 + $0x174] ss:$8 sps:$4 sm:$0xff]  }
 0x438   : > { %3716 = vmatpush1.bf16.msra.mxu1 %v5093_v34  ;;  %v5135_v34 = vld [vmem:[#allocation9 + $0x170] ss:$8 sps:$4 sm:$0xff]  }
 0x439   : > { %3717 = vmatprep.subr.bf16.mxu1 %v5098_v35  ;;  %v5140_v35 = vld [vmem:[#allocation9 + $0x184] ss:$8 sps:$4 sm:$0xff]  }
 0x43c   : > { %3718 = vmatpush1.bf16.msra.mxu1 %v5096_v36  ;;  %v5138_v36 = vld [vmem:[#allocation9 + $0x180] ss:$8 sps:$4 sm:$0xff]  }
 0x43d   : > { %3719 = vmatprep.subr.bf16.mxu1 %v5101_v37  ;;  %v5143_v37 = vld [vmem:[#allocation9 + $0x194] ss:$8 sps:$4 sm:$0xff]  }
 0x440   : > { %3720 = vmatpush1.bf16.msra.mxu1 %v5099_v45  ;;  %v5141_v45 = vld [vmem:[#allocation9 + $0x190] ss:$8 sps:$4 sm:$0xff]  }
 0x441   : > { %3721 = vmatprep.subr.bf16.mxu1 %v5104_v46  ;;  %v5146_v46 = vld [vmem:[#allocation9 + $0x1a4] ss:$8 sps:$4 sm:$0xff]  }
 0x444   : > { %3722 = vmatpush1.bf16.msra.mxu1 %v5102_v47  ;;  %v5144_v47 = vld [vmem:[#allocation9 + $0x1a0] ss:$8 sps:$4 sm:$0xff]  }
 0x445   : > { %3723 = vmatprep.subr.bf16.mxu1 %v5107_v48  ;;  %v5149_v48 = vld [vmem:[#allocation9 + $0x1b4] ss:$8 sps:$4 sm:$0xff]  }
 0x448   : > { %3724 = vmatpush1.bf16.msra.mxu1 %v5105_v49  ;;  %v5147_v49 = vld [vmem:[#allocation9 + $0x1b0] ss:$8 sps:$4 sm:$0xff]  }
 0x449   : > { %3725 = vmatprep.subr.bf16.mxu1 %v5110_v50  ;;  %v5152_v50 = vld [vmem:[#allocation9 + $0x1c4] ss:$8 sps:$4 sm:$0xff]  }
 0x44c   : > { %3726 = vmatpush1.bf16.msra.mxu1 %v5108_v51  ;;  %v5150_v51 = vld [vmem:[#allocation9 + $0x1c0] ss:$8 sps:$4 sm:$0xff]  }
 0x44d   : > { %3727 = vmatprep.subr.bf16.mxu1 %v5113_v52  ;;  %v5155_v52 = vld [vmem:[#allocation9 + $0x1d4] ss:$8 sps:$4 sm:$0xff]  }
 0x450   : > { %3728 = vmatpush1.bf16.msra.mxu1 %v5111_v1  ;;  %v5153_v1 = vld [vmem:[#allocation9 + $0x1d0] ss:$8 sps:$4 sm:$0xff]  }
 0x451   : > { %3738 = vmatprep.subr.bf16.mxu1 %v5116_v53  ;;  %v2956_v53 = vrot.slane %v5768_v3, %v5705_v42  ;;  %v5176_v42 = vld [vmem:[#allocation11 + $0x78] sm:$0xff]   ;;  %v3694_v3 = vrot.slane %v3365_v2, %v5699_v40  ;;  %v3815_v40 = vld [vmem:[%s5849_s12] sm:$0x1] }
 0x452   : > { %4516 = vmatprep.subr.bf16.mxu0 %v5176_v42 }
 0x453   : > { %4517 = vmatpush3.bf16.msra.mxu0 %v5177_v0 }
 0x4e6   : > { %v3122_v7 = vpop.f32.mrb[4].mxu1 }
 0x4e7   : > { %v4536_v8 = vadd.f32 %v3122_v7, %v2948_v4  ;;  %v5777_v9 = vpop.f32.mrb[16].mxu0  ;;  %v3124_v13 = vpop.f32.mrb[5].mxu1 }
 0x4e8   : > { %v4537_v62 = vadd.f32 %v3124_v13, %v2952_v5  ;;  %v3288_v14 = vpop.f32.mrb[17].mxu0  ;;  %v3126_v15 = vpop.f32.mrb[6].mxu1  ;;  %v4538_v56 = vadd.f32 %v5777_v9, %v2956_v53 }
 0x4e9   : > { %v3293_v16 = vmax.f32 %v4536_v8, 0.0  ;;  %v4539_v17 = vadd.f32 %v3288_v14, %v2960_v6  ;;  %v3290_v18 = vpop.f32.mrb[18].mxu0  ;;  %v3127_v19 = vpop.f32.mrb[7].mxu1 }
 0x4ea   : > { %v3294_v20 = vmax.f32 %v4537_v62, 0.0  ;;  %v3291_v21 = vpop.f32.mrb[19].mxu0  ;;  %v3295_v59 = vmax.f32 %v4538_v56, 0.0 }
 0x4eb   : > { %v3296_v22 = vmax.f32 %v4539_v17, 0.0  ;;  %v3297_v39 = vpack.c.bf16 %v3293_v16, %v3293_v16 }
 0x4ec   : > { %v3298_v23 = vpack.c.bf16 %v3294_v20, %v3294_v20  ;;  %v3299_v60 = vpack.c.bf16 %v3295_v59, %v3295_v59 }
 0x4ed   : > { %v3300_v43 = vpack.c.bf16 %v3296_v22, %v3296_v22 }
 0x4ee   : > { %3729 = vmatprep.mubr.bf16.mxu1 %v3298_v23 }
 0x4ef   : > { %3730 = vmatmul.mubr.bf16.vlgmr.msra.gmra.mrb[8].mxu1 %v3297_v39 }
 0x4f0   : > { %3739 = vmatpush1.bf16.msra.mxu1 %v5114_v24  ;;  %3770 = vmatprep.mubr.bf16.mxu1 %v3300_v43 }
 0x4f1   : > { %3740 = vmatprep.subr.bf16.mxu1 %v5119_v10 }
 0x4f4   : > { %3741 = vmatpush1.bf16.msra.mxu1 %v5117_v44 }
 0x4f5   : > { %3742 = vmatprep.subr.bf16.mxu1 %v5122_v11 }
 0x4f8   : > { %3743 = vmatpush1.bf16.msra.mxu1 %v5120_v12 }
 0x4f9   : > { %3744 = vmatprep.subr.bf16.mxu1 %v5125_v25 }
 0x4fc   : > { %3745 = vmatpush1.bf16.msra.mxu1 %v5123_v26 }
 0x4fd   : > { %3746 = vmatprep.subr.bf16.mxu1 %v5128_v27 }
 0x500   : > { %3747 = vmatpush1.bf16.msra.mxu1 %v5126_v28 }
 0x501   : > { %3748 = vmatprep.subr.bf16.mxu1 %v5131_v29 }
 0x504   : > { %3749 = vmatpush1.bf16.msra.mxu1 %v5129_v30 }
 0x505   : > { %3750 = vmatprep.subr.bf16.mxu1 %v5134_v31 }
 0x508   : > { %3751 = vmatpush1.bf16.msra.mxu1 %v5132_v32 }
 0x509   : > { %3752 = vmatprep.subr.bf16.mxu1 %v5137_v33 }
 0x50c   : > { %3753 = vmatpush1.bf16.msra.mxu1 %v5135_v34 }
 0x50d   : > { %3754 = vmatprep.subr.bf16.mxu1 %v5140_v35 }
 0x510   : > { %3755 = vmatpush1.bf16.msra.mxu1 %v5138_v36 }
 0x511   : > { %3756 = vmatprep.subr.bf16.mxu1 %v5143_v37 }
 0x514   : > { %3757 = vmatpush1.bf16.msra.mxu1 %v5141_v45 }
 0x515   : > { %3758 = vmatprep.subr.bf16.mxu1 %v5146_v46 }
 0x518   : > { %3759 = vmatpush1.bf16.msra.mxu1 %v5144_v47 }
 0x519   : > { %3760 = vmatprep.subr.bf16.mxu1 %v5149_v48 }
 0x51c   : > { %3761 = vmatpush1.bf16.msra.mxu1 %v5147_v49 }
 0x51d   : > { %3762 = vmatprep.subr.bf16.mxu1 %v5152_v50 }
 0x520   : > { %3763 = vmatpush1.bf16.msra.mxu1 %v5150_v51 }
 0x521   : > { %3764 = vmatprep.subr.bf16.mxu1 %v5155_v52 }
 0x524   : > { %3765 = vmatpush1.bf16.msra.mxu1 %v5153_v1 }
 0x525   : > { %3766 = vmatprep.subr.bf16.mxu1 %v5158_v54 }
 0x528   : > { %3767 = vmatpush1.bf16.msra.mxu1 %v5156_v55 }
 0x529   : > { %3768 = vmatprep.subr.bf16.mxu1 %v5161_v57 }
 0x52c   : > { %3769 = vmatpush1.bf16.msra.mxu1 %v5159_v58 }
 0x52f   : > { %3771 = vmatmul.mubr.bf16.vlgmr.msra.gmra.mrb[8].mxu1 %v3299_v60 }
 0x602   : > { %v3772_v4 = vpop.f32.mrb[8].mxu1 }
 0x603   : > { %v4540_v5 = vadd.f32 %v3772_v4, %v3690_v38  ;;  %v3774_v6 = vpop.f32.mrb[9].mxu1 }
 0x604   : > { %v4541_v7 = vadd.f32 %v3774_v6, %v3694_v3  ;;  %v3776_v8 = vpop.f32.mrb[10].mxu1 }
 0x605   : > { %v3779_v9 = vmax.f32 %v4540_v5, 0.0  ;;  %v3777_v13 = vpop.f32.mrb[11].mxu1 }
 0x606   : > { %v3780_v62 = vmax.f32 %v4541_v7, 0.0 }
 0x607   : > { %v3781_v15 = vpack.c.bf16 %v3779_v9, %v3779_v9 }
 0x608   : > { %v3782_v14 = vpack.c.bf16 %v3780_v62, %v3780_v62 }
 0x60a   : > { %3944 = vmatprep.mubr.bf16.mxu0 %v3782_v14 }
 0x60b   : > { %3945 = vmatmul.mubr.bf16.vlgmr.msra.gmra.mrb[20].mxu0 %v3781_v15 }
 0x6de   : > { %v4518_v16 = vpop.f32.mrb[20].mxu0 }
 0x6df   : > { %v4519_v41 = vpop.f32.mrb[21].mxu0 }
 0x6e0   : > { %v4520_v17 = vadd.f32 %v4519_v41, %v4518_v16  ;;  %v4521_v18 = vpop.f32.mrb[22].mxu0 }
 0x6e1   : > { %v4522_v19 = vpop.f32.mrb[23].mxu0 }
 0x6e2   : > { %v3947_v20 = vadd.f32 %v4520_v17, %v3815_v40 }
 0x6e4   : > { %3952 = vst [vmem:[%s504_s14] sm:$0x1] %v3947_v20 }
 0x6e5   : > { %5331 = shalt.err (!%p5328_p5)
}
 0x6e6   : > { %s5332_s19 = scalar_lea.hbm %s5795_s20, 16  ;;  %s5336_s15 = scalar_lea.hbm %s5889_s5, 32 }
 0x6e7   : > { %p5333_p0 = scmp.ne.s32.totalorder %s5795_s20, %s5332_s19  ;;  %p5337_p10 = scmp.lt.u32.totalorder %s5795_s20, %s5889_s5 }
 0x6e8   : > { %p5338_p12 = scmp.lt.u32.totalorder %s5336_s15, %s5332_s19  ;;  %p5340_p2 = scmp.lt.u32.totalorder %s5332_s19, %s5795_s20 }
 0x6e9   : > { %p5334_p6 = pnand %p5333_p0, %p5890_p3 }
 0x6ea   : > { %p5339_p1 = por %p5338_p12, %p5337_p10 }
 0x6eb   : > { %p5335_p9 = pneg %p5334_p6 }
 0x6ec   : > { %p5341_p4 = por %p5340_p2, %p5339_p1 }
 0x6ee   : > { %p5342_p7 = pnand %p5341_p4, %p5335_p9 }
 0x6f0   : > { %5345 = shalt.err (!%p5342_p7)
}
 0x6f1   : > { %4590 = dma.vmem_to_hbm [thread:$0]  (%p5890_p3), %s5797_s17, 16, %s5795_s20, %s3954_s23  }
 0x6f2 PF: > { %s5891_s30 = sld [smem:[#allocation19_spill]]  ;;  %s5892_s13 = sld [smem:[#allocation17_spill]] }
 0x6f3   : > { %s5893_s25 = sld [smem:[#allocation23_spill]] }
 0x6f8   : > { %p4622_p8 = scmp.ge.s32.totalorder %s5891_s30, 2  ;;  %s3978_s21 = sand.u32 1, %s5892_s13  }
 0x6f9   : > { %p5894_p11 = scmp.ne.s32.totalorder %s5893_s25, 0  ;;  %s3979_s29 = scalar_lea.sflag [#allocation5], %s3978_s21 }
 0x6fb   : > { %p4609_p13 = pnand %p4622_p8, %p5894_p11 }
 0x6fd   : > { %5375 = dma.done.wait (!%p4609_p13), %s3979_s29, 16  }
 0x6fe   : > { %5377 = vsyncadd (!%p4609_p13), %s3979_s29, 4294967280  ;;  %s5895_s28 = sld [smem:[#allocation20_spill]]  ;;  %s5896_s18 = sld [smem:[#allocation18_spill]] }
 0x6ff   : > { %s5897_s27 = sld [smem:[#allocation21_spill]]  ;;  %s5898_s25 = smov %s5384_s26 }
 0x704   : > { %p26_p5 = scmp.ge.s32.totalorder %s5895_s28, 4   ;;  %s5899_s26 = smov %s5896_s18 }
 0x706   :  { %28 = sbr.rel (!%p26_p5) target bundleno = 9 (0x9), region = 128 }
 0x70d   :  { %3983 = vsyncpa [#allocation4], 1 }
 0x70e   :  { %3985 = vsyncpa [#allocation4 + $0x1], 1 }
 0x70f   :  { %3986 = vsyncpa [#allocation7], 1 }
 0x710   :  { %3987 = vsyncpa [#allocation10], 1 }
 0x711   :  { %3988 = vsyncpa [#allocation5], 1 }
 0x712   :  { %3990 = vsyncpa [#allocation5 + $0x1], 1 }

</bundles_post_ra>
